<compile_context>
chip_gen: v6e
topology: v6e:2x2x1
jax: 0.10.0
libtpu: 0.0.40
codegen_flags: <defaults>
</compile_context>

<pallas_src>
import jax
import jax.numpy as jnp
from jax.experimental import pallas as pl
from jax.experimental.pallas import tpu as pltpu


# ----------------------------------------------------------------------------
# Pallas kernel: JointNet tile
# ----------------------------------------------------------------------------
def joint_kernel(enc_ref, dec_ref, w1e_ref, w1d_ref, b1_ref, w2_ref, b2_ref,
                 out_ref, ep_ref, h_ref):
    tT, H = ep_ref.shape
    tU = dec_ref.shape[1]
    tV = w2_ref.shape[1]

    u_idx = pl.program_id(2)
    v_idx = pl.program_id(3)

    # enc projection (+ bias): once per (batch, T-tile); reused across U,V tiles.
    @pl.when((u_idx == 0) & (v_idx == 0))
    def _():
        ep_ref[...] = (
            jnp.dot(enc_ref[0], w1e_ref[...], preferred_element_type=jnp.float32)
            + b1_ref[...])                                         # (tT, H) f32

    # hidden tile: once per (batch, T-tile, U-tile); reused across V tiles.
    # Broadcast-add + tanh in bf16 (bf16 VPU/EUP on v6e/v7x) halves the
    # (tT, tU, H) transient and feeds the MXU directly.
    # TODO(synk): on v5e (no bf16 VPU/EUP) keep the add/tanh in f32.
    @pl.when(v_idx == 0)
    def _():
        dp = jnp.dot(dec_ref[0], w1d_ref[...],
                     preferred_element_type=jnp.float32)           # (tU, H) f32
        ep_b = ep_ref[...].astype(jnp.bfloat16)
        dp_b = dp.astype(jnp.bfloat16)
        h = jnp.tanh(ep_b[:, None, :] + dp_b[None, :, :])          # (tT,tU,H) bf16
        h_ref[...] = h.reshape(tT * tU, H)

    # project_layer: single lane-dense MXU matmul, f32 accumulation, bf16 store
    # (logits writeback is the dominant HBM traffic -> emit bf16 everywhere).
    logits = jnp.dot(h_ref[...], w2_ref[...],
                     preferred_element_type=jnp.float32)           # (tT*tU, tV)
    out_ref[0] = (logits + b2_ref[...]).reshape(tT, tU, tV).astype(out_ref.dtype)


def _round_up(x, m):
    return (x + m - 1) // m * m


def _pick_tile(dim, caps, align):
    """Pick a tile size from `caps` (plus an exact-fit candidate) minimizing
    padded extent; ties break toward the larger tile (fewer grid steps)."""
    dim_a = _round_up(max(dim, 1), align)
    cands = {c for c in caps if c <= dim_a}
    cands.add(min(dim_a, max(caps)))
    best, best_padded = None, None
    for c in sorted(cands):
        padded = _round_up(dim, c)
        if best is None or padded < best_padded or (padded == best_padded and c > best):
            best, best_padded = c, padded
    return best


def joint_net_pallas(enc_state, dec_state, w1e, w1d, b1, w2, b2,
                     *, return_padded=False):
    """logits[b,t,u,:] = W2 @ tanh(W1e@enc[b,t] + W1d@dec[b,u] + b1) + b2 (bf16)."""
    B, T, De = enc_state.shape
    _, U, Dd = dec_state.shape
    H = w1e.shape[1]
    V = w2.shape[1]

    # Chip-aware tiling: smaller tU / tV on 64 MiB-VMEM parts (v7x), larger tV
    # on 128 MiB parts (v5e/v6e) to halve grid-step count and w2 re-fetches.
    try:
        vmem_cap = int(pltpu.get_tpu_info().vmem_capacity_bytes)
    except Exception:
        vmem_cap = 64 << 20          # conservative fallback
    small_vmem = vmem_cap <= (64 << 20)

    tT = _pick_tile(T, (128, 96, 64, 32), 8)
    tU = _pick_tile(U, (16, 8) if small_vmem else (32, 24, 16, 8), 8)
    tv_cap = 512 if small_vmem else 1024
    tV = _pick_tile(V, tuple(range(tv_cap, 0, -128)), 128)
    Tp, Up, Vp = _round_up(T, tT), _round_up(U, tU), _round_up(V, tV)

    # bf16 matmul operands (f32 accumulation inside the kernel); cast BEFORE the
    # pad so the pad copies move half the bytes.
    enc_p = jnp.pad(enc_state.astype(jnp.bfloat16), ((0, 0), (0, Tp - T), (0, 0)))
    dec_p = jnp.pad(dec_state.astype(jnp.bfloat16), ((0, 0), (0, Up - U), (0, 0)))
    w1e_b = w1e.astype(jnp.bfloat16)
    w1d_b = w1d.astype(jnp.bfloat16)
    w2_p = jnp.pad(w2.astype(jnp.bfloat16), ((0, 0), (0, Vp - V)))
    b1_p = b1.reshape(1, H).astype(jnp.float32)
    b2_p = jnp.pad(b2.reshape(1, V), ((0, 0), (0, Vp - V))).astype(jnp.float32)

    # Explicit VMEM budget (~3/4 of physical: ~96 MiB on v5e/v6e, ~48 MiB on v7x).
    vmem_limit = min((vmem_cap * 3) // 4, 96 << 20)

    # Advisory cost estimate so XLA can schedule encoder/decoder around the call.
    flops = int(2 * B * Tp * De * H
                + 2 * B * (Tp // tT) * Up * Dd * H
                + 2 * B * Tp * Up * H * Vp)
    transcendentals = int(B * Tp * Up * H)
    bytes_accessed = int(
        2 * (enc_p.size + dec_p.size + w1e_b.size + w1d_b.size + w2_p.size)
        + 4 * (b1_p.size + b2_p.size)
        + 2 * B * Tp * Up * Vp)
    cost = pl.CostEstimate(flops=flops, transcendentals=transcendentals,
                           bytes_accessed=bytes_accessed)

    def _build(weight_mode):
        weight_kw = {} if weight_mode is None else dict(pipeline_mode=weight_mode)
        return pl.pallas_call(
            joint_kernel,
            out_shape=jax.ShapeDtypeStruct((B, Tp, Up, Vp), jnp.bfloat16),
            grid=(B, Tp // tT, Up // tU, Vp // tV),
            in_specs=[
                pl.BlockSpec((1, tT, De), lambda b, i, j, v: (b, i, 0)),
                pl.BlockSpec((1, tU, Dd), lambda b, i, j, v: (b, j, 0)),
                pl.BlockSpec((De, H), lambda b, i, j, v: (0, 0), **weight_kw),
                pl.BlockSpec((Dd, H), lambda b, i, j, v: (0, 0), **weight_kw),
                pl.BlockSpec((1, H), lambda b, i, j, v: (0, 0), **weight_kw),
                pl.BlockSpec((H, tV), lambda b, i, j, v: (0, v)),
                pl.BlockSpec((1, tV), lambda b, i, j, v: (0, v)),
            ],
            out_specs=pl.BlockSpec((1, tT, tU, tV), lambda b, i, j, v: (b, i, j, v)),
            scratch_shapes=[
                pltpu.VMEM((tT, H), jnp.float32),        # ep cache (per T-tile)
                pltpu.VMEM((tT * tU, H), jnp.bfloat16),  # h cache  (per T,U-tile)
            ],
            compiler_params=pltpu.CompilerParams(
                dimension_semantics=("parallel", "parallel",
                                     "arbitrary", "arbitrary"),
                vmem_limit_bytes=vmem_limit),
            cost_estimate=cost,
        )

    args = (enc_p, dec_p, w1e_b, w1d_b, b1_p, w2_p, b2_p)
    try:
        # Constant-index weight tiles single-buffered: their index_map never
        # changes, so the second pipeline buffer is pure VMEM waste.
        out = _build(pl.Buffered(1))(*args)
    except Exception:
        out = _build(None)(*args)     # fallback if Buffered(1) is unsupported

    # Avoid the extra HBM pass of a post-kernel slice whenever the tiles divide
    # the true extents exactly (callers with an RNN-T loss can also pass
    # return_padded=True and mask padded T/U/V positions instead).
    if return_padded or (Tp, Up, Vp) == (T, U, V):
        return out
    return out[:, :T, :U, :V]


# ----------------------------------------------------------------------------
# Transducer forward (glue in plain JAX, joint in Pallas)
# ----------------------------------------------------------------------------
def transducer_forward(params, inputs, targets):
    # targets = F.pad(targets, [1, 0, 0, 0], value=0)  -> prepend blank
    targets = jnp.pad(targets, ((0, 0), (1, 0)), constant_values=0)

    # TODO(synk): BuildEncoder/BuildDecoder and look_ahead_mask were not
    # provided in the source module; deterministic linear / embedding stand-ins
    # are used (a causal label mask has no effect on these stand-ins).
    enc_state = jnp.tanh(inputs @ params["enc_w"] + params["enc_b"])       # (B,T,De)
    emb = params["embedding"][targets]                                     # (B,U,E)
    dec_state = jnp.tanh(emb @ params["dec_w"] + params["dec_b"])          # (B,U,Dd)

    # JointNet (Pallas hot path).  PyTorch Linear weight W has shape
    # (out, in); split forward_layer weight along the concat axis.
    De = enc_state.shape[-1]
    W1, b1 = params["joint_w1"], params["joint_b1"]      # (H, De+Dd), (H,)
    W2, b2 = params["joint_w2"], params["joint_b2"]      # (V, H),     (V,)
    w1e = W1[:, :De].T                                   # (De, H)
    w1d = W1[:, De:].T                                   # (Dd, H)
    # bf16 logits; downstream softmax / RNN-T loss should be computed in f32.
    logits = joint_net_pallas(enc_state, dec_state, w1e, w1d, b1, W2.T, b2)
    return logits


def transducer_forward_ref(params, inputs, targets):
    """Pure-JAX f32 reference replicating the PyTorch JointNet semantics."""
    targets = jnp.pad(targets, ((0, 0), (1, 0)), constant_values=0)
    enc_state = jnp.tanh(inputs @ params["enc_w"] + params["enc_b"])
    emb = params["embedding"][targets]
    dec_state = jnp.tanh(emb @ params["dec_w"] + params["dec_b"])

    B, T, De = enc_state.shape
    _, U, Dd = dec_state.shape
    e = jnp.broadcast_to(enc_state[:, :, None, :], (B, T, U, De))
    d = jnp.broadcast_to(dec_state[:, None, :, :], (B, T, U, Dd))
    concat = jnp.concatenate([e, d], axis=-1)
    h = jnp.tanh(concat @ params["joint_w1"].T + params["joint_b1"])
    return h @ params["joint_w2"].T + params["joint_b2"]


# ----------------------------------------------------------------------------
def make_params(key, feat, enc_dim, dec_dim, emb_dim, inner, vocab,
                share_embedding=True):
    ks = jax.random.split(key, 8)
    scale = 0.1
    params = {
        "enc_w": scale * jax.random.normal(ks[0], (feat, enc_dim), jnp.float32),
        "enc_b": scale * jax.random.normal(ks[1], (enc_dim,), jnp.float32),
        "embedding": scale * jax.random.normal(ks[2], (vocab, emb_dim), jnp.float32),
        "dec_w": scale * jax.random.normal(ks[3], (emb_dim, dec_dim), jnp.float32),
        "dec_b": scale * jax.random.normal(ks[4], (dec_dim,), jnp.float32),
        "joint_w1": scale * jax.random.normal(ks[5], (inner, enc_dim + dec_dim),
                                              jnp.float32),
        "joint_b1": scale * jax.random.normal(ks[6], (inner,), jnp.float32),
        "joint_b2": scale * jax.random.normal(ks[7], (vocab,), jnp.float32),
    }
    if share_embedding:
        # config.share_embedding: project_layer.weight tied to embedding.weight
        assert emb_dim == inner
        params["joint_w2"] = params["embedding"]          # (vocab, inner)
    else:
        params["joint_w2"] = scale * jax.random.normal(
            jax.random.PRNGKey(99), (vocab, inner), jnp.float32)
    return params


if __name__ == "__main__":
    B, T, F = 2, 8, 16          # batch, audio frames, audio features
    U0 = 4                      # target length (becomes U = 5 after blank pad)
    enc_dim, dec_dim = 32, 32
    inner, emb_dim = 32, 32
    vocab = 16

    key = jax.random.PRNGKey(0)
    k_in, k_tgt, k_par = jax.random.split(key, 3)

    inputs = jax.random.normal(k_in, (B, T, F), jnp.float32)
    targets = jax.random.randint(k_tgt, (B, U0), 1, vocab, dtype=jnp.int32)
    params = make_params(k_par, F, enc_dim, dec_dim, emb_dim, inner, vocab,
                         share_embedding=True)

    logits = jax.block_until_ready(transducer_forward(params, inputs, targets))
    ref = jax.block_until_ready(transducer_forward_ref(params, inputs, targets))

    assert logits.shape == (B, T, U0 + 1, vocab), logits.shape
    assert logits.dtype == jnp.bfloat16, logits.dtype
    # bf16 operands / bf16 hidden / bf16 logits with f32 accumulation
    # -> relaxed tolerance vs f32 reference.
    err = jnp.max(jnp.abs(logits.astype(jnp.float32) - ref))
    assert jnp.allclose(logits.astype(jnp.float32), ref, atol=4e-2, rtol=4e-2), float(err)
    print("KERNEL_OK")
</pallas_src>

<mosaic_0001>
module attributes {stable_mosaic.version = 11 : i64} {
  func.func @joint_kernel(%arg0: i32, %arg1: i32, %arg2: i32, %arg3: i32, %arg4: memref<1x8x32xbf16, #tpu.memory_space<vmem>>, %arg5: memref<1x8x32xbf16, #tpu.memory_space<vmem>>, %arg6: memref<32x32xbf16, #tpu.memory_space<vmem>>, %arg7: memref<32x32xbf16, #tpu.memory_space<vmem>>, %arg8: memref<1x32xf32, #tpu.memory_space<vmem>>, %arg9: memref<32x128xbf16, #tpu.memory_space<vmem>>, %arg10: memref<1x128xf32, #tpu.memory_space<vmem>>, %arg11: memref<1x8x8x128xbf16, #tpu.memory_space<vmem>>, %arg12: memref<8x32xf32, #tpu.memory_space<vmem>>, %arg13: memref<64x32xbf16, #tpu.memory_space<vmem>>) attributes {dimension_semantics = [#tpu.dimension_semantics<parallel>, #tpu.dimension_semantics<parallel>, #tpu.dimension_semantics<arbitrary>, #tpu.dimension_semantics<arbitrary>], iteration_bounds = array<i64: 2, 1, 1, 1>, scalar_prefetch = 0 : i64, scratch_operands = 2 : i64, tpu.core_type = #tpu.core_type<tc>, window_params = [{transform_indices = @transform_0, window_bounds = array<i64: 1, 8, 32>}, {transform_indices = @transform_1, window_bounds = array<i64: 1, 8, 32>}, {pipeline_mode = #tpu.pipeline_mode<synchronous>, transform_indices = @transform_2, window_bounds = array<i64: 32, 32>}, {pipeline_mode = #tpu.pipeline_mode<synchronous>, transform_indices = @transform_3, window_bounds = array<i64: 32, 32>}, {pipeline_mode = #tpu.pipeline_mode<synchronous>, transform_indices = @transform_4, window_bounds = array<i64: 1, 32>}, {transform_indices = @transform_5, window_bounds = array<i64: 32, 128>}, {transform_indices = @transform_6, window_bounds = array<i64: 1, 128>}, {transform_indices = @transform_7, window_bounds = array<i64: 1, 8, 8, 128>}]} {
    %c0_i32 = arith.constant 0 : i32
    %0 = arith.cmpi eq, %arg2, %c0_i32 : i32
    %c0_i32_0 = arith.constant 0 : i32
    %1 = arith.cmpi eq, %arg3, %c0_i32_0 : i32
    %2 = arith.andi %0, %1 : i1
    %3 = arith.extui %2 : i1 to i32
    %c0_i32_1 = arith.constant 0 : i32
    %4 = arith.cmpi ne, %3, %c0_i32_1 : i32
    scf.if %4 {
      %c0_13 = arith.constant 0 : index
      %c0_14 = arith.constant 0 : index
      %c0_15 = arith.constant 0 : index
      %19 = vector.load %arg4[%c0_13, %c0_14, %c0_15] : memref<1x8x32xbf16, #tpu.memory_space<vmem>>, vector<1x8x32xbf16>
      %20 = vector.shape_cast %19 : vector<1x8x32xbf16> to vector<8x32xbf16>
      %c0_16 = arith.constant 0 : index
      %c0_17 = arith.constant 0 : index
      %21 = vector.load %arg6[%c0_16, %c0_17] : memref<32x32xbf16, #tpu.memory_space<vmem>>, vector<32x32xbf16>
      %cst_18 = arith.constant dense<0.000000e+00> : vector<8x32xf32>
      %22 = tpu.matmul %20, %21, %cst_18 {dimension_numbers = #tpu.dot_dimension_numbers<[1], [0], [0], [1], [0, 0, 1, 1], [], []>} : vector<8x32xbf16>, vector<32x32xbf16>, vector<8x32xf32> -> vector<8x32xf32>
      %c0_19 = arith.constant 0 : index
      %c0_20 = arith.constant 0 : index
      %23 = vector.load %arg8[%c0_19, %c0_20] : memref<1x32xf32, #tpu.memory_space<vmem>>, vector<1x32xf32>
      %24 = vector.broadcast %23 : vector<1x32xf32> to vector<8x32xf32>
      %25 = arith.addf %22, %24 : vector<8x32xf32>
      %c0_21 = arith.constant 0 : index
      %c0_22 = arith.constant 0 : index
      %26 = vector.load %arg12[%c0_21, %c0_22] : memref<8x32xf32, #tpu.memory_space<vmem>>, vector<8x32xf32>
      tpu.vector_store %arg12[%c0_21, %c0_22], %25 {strides = array<i32>} : memref<8x32xf32, #tpu.memory_space<vmem>>, vector<8x32xf32>,
    } else {
    }
    %c0_i32_2 = arith.constant 0 : i32
    %5 = arith.cmpi eq, %arg3, %c0_i32_2 : i32
    %6 = arith.extui %5 : i1 to i32
    %c0_i32_3 = arith.constant 0 : i32
    %7 = arith.cmpi ne, %6, %c0_i32_3 : i32
    scf.if %7 {
      %c0_13 = arith.constant 0 : index
      %c0_14 = arith.constant 0 : index
      %c0_15 = arith.constant 0 : index
      %19 = vector.load %arg5[%c0_13, %c0_14, %c0_15] : memref<1x8x32xbf16, #tpu.memory_space<vmem>>, vector<1x8x32xbf16>
      %20 = vector.shape_cast %19 : vector<1x8x32xbf16> to vector<8x32xbf16>
      %c0_16 = arith.constant 0 : index
      %c0_17 = arith.constant 0 : index
      %21 = vector.load %arg7[%c0_16, %c0_17] : memref<32x32xbf16, #tpu.memory_space<vmem>>, vector<32x32xbf16>
      %cst_18 = arith.constant dense<0.000000e+00> : vector<8x32xf32>
      %22 = tpu.matmul %20, %21, %cst_18 {dimension_numbers = #tpu.dot_dimension_numbers<[1], [0], [0], [1], [0, 0, 1, 1], [], []>} : vector<8x32xbf16>, vector<32x32xbf16>, vector<8x32xf32> -> vector<8x32xf32>
      %c0_19 = arith.constant 0 : index
      %c0_20 = arith.constant 0 : index
      %23 = vector.load %arg12[%c0_19, %c0_20] : memref<8x32xf32, #tpu.memory_space<vmem>>, vector<8x32xf32>
      %24 = arith.truncf %23 : vector<8x32xf32> to vector<8x32xbf16>
      %25 = arith.truncf %22 : vector<8x32xf32> to vector<8x32xbf16>
      %26 = vector.shape_cast %24 : vector<8x32xbf16> to vector<8x1x32xbf16>
      %27 = vector.shape_cast %25 : vector<8x32xbf16> to vector<1x8x32xbf16>
      %28 = vector.broadcast %26 : vector<8x1x32xbf16> to vector<8x8x32xbf16>
      %29 = vector.broadcast %27 : vector<1x8x32xbf16> to vector<8x8x32xbf16>
      %30 = arith.addf %28, %29 : vector<8x8x32xbf16>
      %31 = math.tanh %30 : vector<8x8x32xbf16>
      %32 = vector.shape_cast %31 : vector<8x8x32xbf16> to vector<64x32xbf16>
      %c0_21 = arith.constant 0 : index
      %c0_22 = arith.constant 0 : index
      %33 = vector.load %arg13[%c0_21, %c0_22] : memref<64x32xbf16, #tpu.memory_space<vmem>>, vector<64x32xbf16>
      tpu.vector_store %arg13[%c0_21, %c0_22], %32 {strides = array<i32>} : memref<64x32xbf16, #tpu.memory_space<vmem>>, vector<64x32xbf16>,
    } else {
    }
    %c0 = arith.constant 0 : index
    %c0_4 = arith.constant 0 : index
    %8 = vector.load %arg13[%c0, %c0_4] : memref<64x32xbf16, #tpu.memory_space<vmem>>, vector<64x32xbf16>
    %c0_5 = arith.constant 0 : index
    %c0_6 = arith.constant 0 : index
    %9 = vector.load %arg9[%c0_5, %c0_6] : memref<32x128xbf16, #tpu.memory_space<vmem>>, vector<32x128xbf16>
    %cst = arith.constant dense<0.000000e+00> : vector<64x128xf32>
    %10 = tpu.matmul %8, %9, %cst {dimension_numbers = #tpu.dot_dimension_numbers<[1], [0], [0], [1], [0, 0, 1, 1], [], []>} : vector<64x32xbf16>, vector<32x128xbf16>, vector<64x128xf32> -> vector<64x128xf32>
    %c0_7 = arith.constant 0 : index
    %c0_8 = arith.constant 0 : index
    %11 = vector.load %arg10[%c0_7, %c0_8] : memref<1x128xf32, #tpu.memory_space<vmem>>, vector<1x128xf32>
    %12 = vector.broadcast %11 : vector<1x128xf32> to vector<64x128xf32>
    %13 = arith.addf %10, %12 : vector<64x128xf32>
    %14 = vector.shape_cast %13 : vector<64x128xf32> to vector<8x8x128xf32>
    %15 = arith.truncf %14 : vector<8x8x128xf32> to vector<8x8x128xbf16>
    %c0_9 = arith.constant 0 : index
    %c0_10 = arith.constant 0 : index
    %c0_11 = arith.constant 0 : index
    %c0_12 = arith.constant 0 : index
    %16 = vector.load %arg11[%c0_9, %c0_10, %c0_11, %c0_12] : memref<1x8x8x128xbf16, #tpu.memory_space<vmem>>, vector<1x8x8x128xbf16>
    %17 = vector.shape_cast %16 : vector<1x8x8x128xbf16> to vector<8x8x128xbf16>
    %18 = vector.shape_cast %15 : vector<8x8x128xbf16> to vector<1x8x8x128xbf16>
    tpu.vector_store %arg11[%c0_9, %c0_10, %c0_11, %c0_12], %18 {strides = array<i32>} : memref<1x8x8x128xbf16, #tpu.memory_space<vmem>>, vector<1x8x8x128xbf16>,
    return
  }
  func.func @transform_0(%arg0: i32, %arg1: i32, %arg2: i32, %arg3: i32) -> (i32, i32, i32) {
    %c0_i32 = arith.constant 0 : i32
    %c0_i32_0 = arith.constant 0 : i32
    return %arg0, %arg1, %c0_i32 : i32, i32, i32
  }
  func.func @transform_1(%arg0: i32, %arg1: i32, %arg2: i32, %arg3: i32) -> (i32, i32, i32) {
    %c0_i32 = arith.constant 0 : i32
    %c0_i32_0 = arith.constant 0 : i32
    return %arg0, %arg2, %c0_i32 : i32, i32, i32
  }
  func.func @transform_2(%arg0: i32, %arg1: i32, %arg2: i32, %arg3: i32) -> (i32, i32) {
    %c0_i32 = arith.constant 0 : i32
    %c0_i32_0 = arith.constant 0 : i32
    %c0_i32_1 = arith.constant 0 : i32
    return %c0_i32, %c0_i32_0 : i32, i32
  }
  func.func @transform_3(%arg0: i32, %arg1: i32, %arg2: i32, %arg3: i32) -> (i32, i32) {
    %c0_i32 = arith.constant 0 : i32
    %c0_i32_0 = arith.constant 0 : i32
    %c0_i32_1 = arith.constant 0 : i32
    return %c0_i32, %c0_i32_0 : i32, i32
  }
  func.func @transform_4(%arg0: i32, %arg1: i32, %arg2: i32, %arg3: i32) -> (i32, i32) {
    %c0_i32 = arith.constant 0 : i32
    %c0_i32_0 = arith.constant 0 : i32
    %c0_i32_1 = arith.constant 0 : i32
    return %c0_i32, %c0_i32_0 : i32, i32
  }
  func.func @transform_5(%arg0: i32, %arg1: i32, %arg2: i32, %arg3: i32) -> (i32, i32) {
    %c0_i32 = arith.constant 0 : i32
    %c0_i32_0 = arith.constant 0 : i32
    return %c0_i32, %arg3 : i32, i32
  }
  func.func @transform_6(%arg0: i32, %arg1: i32, %arg2: i32, %arg3: i32) -> (i32, i32) {
    %c0_i32 = arith.constant 0 : i32
    %c0_i32_0 = arith.constant 0 : i32
    return %c0_i32, %arg3 : i32, i32
  }
  func.func @transform_7(%arg0: i32, %arg1: i32, %arg2: i32, %arg3: i32) -> (i32, i32, i32, i32) {
    %c0_i32 = arith.constant 0 : i32
    return %arg0, %arg1, %arg2, %arg3 : i32, i32, i32, i32
  }
}

module attributes {stable_mosaic.version = 11 : i64} {
  func.func @joint_kernel(%arg0: i32, %arg1: i32, %arg2: i32, %arg3: i32, %arg4: memref<1x8x32xbf16, #tpu.memory_space<vmem>>, %arg5: memref<1x8x32xbf16, #tpu.memory_space<vmem>>, %arg6: memref<32x32xbf16, #tpu.memory_space<vmem>>, %arg7: memref<32x32xbf16, #tpu.memory_space<vmem>>, %arg8: memref<1x32xf32, #tpu.memory_space<vmem>>, %arg9: memref<32x128xbf16, #tpu.memory_space<vmem>>, %arg10: memref<1x128xf32, #tpu.memory_space<vmem>>, %arg11: memref<1x8x8x128xbf16, #tpu.memory_space<vmem>>, %arg12: memref<8x32xf32, #tpu.memory_space<vmem>>, %arg13: memref<64x32xbf16, #tpu.memory_space<vmem>>) attributes {dimension_semantics = [#tpu.dimension_semantics<parallel>, #tpu.dimension_semantics<parallel>, #tpu.dimension_semantics<arbitrary>, #tpu.dimension_semantics<arbitrary>], iteration_bounds = array<i64: 2, 1, 1, 1>, scalar_prefetch = 0 : i64, scratch_operands = 2 : i64, tpu.core_type = #tpu.core_type<tc>, window_params = [{transform_indices = @transform_0, window_bounds = array<i64: 1, 8, 32>}, {transform_indices = @transform_1, window_bounds = array<i64: 1, 8, 32>}, {pipeline_mode = #tpu.pipeline_mode<synchronous>, transform_indices = @transform_2, window_bounds = array<i64: 32, 32>}, {pipeline_mode = #tpu.pipeline_mode<synchronous>, transform_indices = @transform_3, window_bounds = array<i64: 32, 32>}, {pipeline_mode = #tpu.pipeline_mode<synchronous>, transform_indices = @transform_4, window_bounds = array<i64: 1, 32>}, {transform_indices = @transform_5, window_bounds = array<i64: 32, 128>}, {transform_indices = @transform_6, window_bounds = array<i64: 1, 128>}, {transform_indices = @transform_7, window_bounds = array<i64: 1, 8, 8, 128>}]} {
    %c0_i32 = arith.constant 0 : i32
    %0 = arith.cmpi eq, %arg2, %c0_i32 : i32
    %c0_i32_0 = arith.constant 0 : i32
    %1 = arith.cmpi eq, %arg3, %c0_i32_0 : i32
    %2 = arith.andi %0, %1 : i1
    %3 = arith.extui %2 : i1 to i32
    %c0_i32_1 = arith.constant 0 : i32
    %4 = arith.cmpi ne, %3, %c0_i32_1 : i32
    scf.if %4 {
      %c0_13 = arith.constant 0 : index
      %c0_14 = arith.constant 0 : index
      %c0_15 = arith.constant 0 : index
      %19 = vector.load %arg4[%c0_13, %c0_14, %c0_15] : memref<1x8x32xbf16, #tpu.memory_space<vmem>>, vector<1x8x32xbf16>
      %20 = vector.shape_cast %19 : vector<1x8x32xbf16> to vector<8x32xbf16>
      %c0_16 = arith.constant 0 : index
      %c0_17 = arith.constant 0 : index
      %21 = vector.load %arg6[%c0_16, %c0_17] : memref<32x32xbf16, #tpu.memory_space<vmem>>, vector<32x32xbf16>
      %cst_18 = arith.constant dense<0.000000e+00> : vector<8x32xf32>
      %22 = tpu.matmul %20, %21, %cst_18 {dimension_numbers = #tpu.dot_dimension_numbers<[1], [0], [0], [1], [0, 0, 1, 1], [], []>} : vector<8x32xbf16>, vector<32x32xbf16>, vector<8x32xf32> -> vector<8x32xf32>
      %c0_19 = arith.constant 0 : index
      %c0_20 = arith.constant 0 : index
      %23 = vector.load %arg8[%c0_19, %c0_20] : memref<1x32xf32, #tpu.memory_space<vmem>>, vector<1x32xf32>
      %24 = vector.broadcast %23 : vector<1x32xf32> to vector<8x32xf32>
      %25 = arith.addf %22, %24 : vector<8x32xf32>
      %c0_21 = arith.constant 0 : index
      %c0_22 = arith.constant 0 : index
      %26 = vector.load %arg12[%c0_21, %c0_22] : memref<8x32xf32, #tpu.memory_space<vmem>>, vector<8x32xf32>
      tpu.vector_store %arg12[%c0_21, %c0_22], %25 {strides = array<i32>} : memref<8x32xf32, #tpu.memory_space<vmem>>, vector<8x32xf32>,
    } else {
    }
    %c0_i32_2 = arith.constant 0 : i32
    %5 = arith.cmpi eq, %arg3, %c0_i32_2 : i32
    %6 = arith.extui %5 : i1 to i32
    %c0_i32_3 = arith.constant 0 : i32
    %7 = arith.cmpi ne, %6, %c0_i32_3 : i32
    scf.if %7 {
      %c0_13 = arith.constant 0 : index
      %c0_14 = arith.constant 0 : index
      %c0_15 = arith.constant 0 : index
      %19 = vector.load %arg5[%c0_13, %c0_14, %c0_15] : memref<1x8x32xbf16, #tpu.memory_space<vmem>>, vector<1x8x32xbf16>
      %20 = vector.shape_cast %19 : vector<1x8x32xbf16> to vector<8x32xbf16>
      %c0_16 = arith.constant 0 : index
      %c0_17 = arith.constant 0 : index
      %21 = vector.load %arg7[%c0_16, %c0_17] : memref<32x32xbf16, #tpu.memory_space<vmem>>, vector<32x32xbf16>
      %cst_18 = arith.constant dense<0.000000e+00> : vector<8x32xf32>
      %22 = tpu.matmul %20, %21, %cst_18 {dimension_numbers = #tpu.dot_dimension_numbers<[1], [0], [0], [1], [0, 0, 1, 1], [], []>} : vector<8x32xbf16>, vector<32x32xbf16>, vector<8x32xf32> -> vector<8x32xf32>
      %c0_19 = arith.constant 0 : index
      %c0_20 = arith.constant 0 : index
      %23 = vector.load %arg12[%c0_19, %c0_20] : memref<8x32xf32, #tpu.memory_space<vmem>>, vector<8x32xf32>
      %24 = arith.truncf %23 : vector<8x32xf32> to vector<8x32xbf16>
      %25 = arith.truncf %22 : vector<8x32xf32> to vector<8x32xbf16>
      %26 = vector.shape_cast %24 : vector<8x32xbf16> to vector<8x1x32xbf16>
      %27 = vector.shape_cast %25 : vector<8x32xbf16> to vector<1x8x32xbf16>
      %28 = vector.broadcast %26 : vector<8x1x32xbf16> to vector<8x8x32xbf16>
      %29 = vector.broadcast %27 : vector<1x8x32xbf16> to vector<8x8x32xbf16>
      %30 = arith.addf %28, %29 : vector<8x8x32xbf16>
      %31 = math.tanh %30 : vector<8x8x32xbf16>
      %32 = vector.shape_cast %31 : vector<8x8x32xbf16> to vector<64x32xbf16>
      %c0_21 = arith.constant 0 : index
      %c0_22 = arith.constant 0 : index
      %33 = vector.load %arg13[%c0_21, %c0_22] : memref<64x32xbf16, #tpu.memory_space<vmem>>, vector<64x32xbf16>
      tpu.vector_store %arg13[%c0_21, %c0_22], %32 {strides = array<i32>} : memref<64x32xbf16, #tpu.memory_space<vmem>>, vector<64x32xbf16>,
    } else {
    }
    %c0 = arith.constant 0 : index
    %c0_4 = arith.constant 0 : index
    %8 = vector.load %arg13[%c0, %c0_4] : memref<64x32xbf16, #tpu.memory_space<vmem>>, vector<64x32xbf16>
    %c0_5 = arith.constant 0 : index
    %c0_6 = arith.constant 0 : index
    %9 = vector.load %arg9[%c0_5, %c0_6] : memref<32x128xbf16, #tpu.memory_space<vmem>>, vector<32x128xbf16>
    %cst = arith.constant dense<0.000000e+00> : vector<64x128xf32>
    %10 = tpu.matmul %8, %9, %cst {dimension_numbers = #tpu.dot_dimension_numbers<[1], [0], [0], [1], [0, 0, 1, 1], [], []>} : vector<64x32xbf16>, vector<32x128xbf16>, vector<64x128xf32> -> vector<64x128xf32>
    %c0_7 = arith.constant 0 : index
    %c0_8 = arith.constant 0 : index
    %11 = vector.load %arg10[%c0_7, %c0_8] : memref<1x128xf32, #tpu.memory_space<vmem>>, vector<1x128xf32>
    %12 = vector.broadcast %11 : vector<1x128xf32> to vector<64x128xf32>
    %13 = arith.addf %10, %12 : vector<64x128xf32>
    %14 = vector.shape_cast %13 : vector<64x128xf32> to vector<8x8x128xf32>
    %15 = arith.truncf %14 : vector<8x8x128xf32> to vector<8x8x128xbf16>
    %c0_9 = arith.constant 0 : index
    %c0_10 = arith.constant 0 : index
    %c0_11 = arith.constant 0 : index
    %c0_12 = arith.constant 0 : index
    %16 = vector.load %arg11[%c0_9, %c0_10, %c0_11, %c0_12] : memref<1x8x8x128xbf16, #tpu.memory_space<vmem>>, vector<1x8x8x128xbf16>
    %17 = vector.shape_cast %16 : vector<1x8x8x128xbf16> to vector<8x8x128xbf16>
    %18 = vector.shape_cast %15 : vector<8x8x128xbf16> to vector<1x8x8x128xbf16>
    tpu.vector_store %arg11[%c0_9, %c0_10, %c0_11, %c0_12], %18 {strides = array<i32>} : memref<1x8x8x128xbf16, #tpu.memory_space<vmem>>, vector<1x8x8x128xbf16>,
    return
  }
  func.func @transform_0(%arg0: i32, %arg1: i32, %arg2: i32, %arg3: i32) -> (i32, i32, i32) {
    %c0_i32 = arith.constant 0 : i32
    %c0_i32_0 = arith.constant 0 : i32
    return %arg0, %arg1, %c0_i32 : i32, i32, i32
  }
  func.func @transform_1(%arg0: i32, %arg1: i32, %arg2: i32, %arg3: i32) -> (i32, i32, i32) {
    %c0_i32 = arith.constant 0 : i32
    %c0_i32_0 = arith.constant 0 : i32
    return %arg0, %arg2, %c0_i32 : i32, i32, i32
  }
  func.func @transform_2(%arg0: i32, %arg1: i32, %arg2: i32, %arg3: i32) -> (i32, i32) {
    %c0_i32 = arith.constant 0 : i32
    %c0_i32_0 = arith.constant 0 : i32
    %c0_i32_1 = arith.constant 0 : i32
    return %c0_i32, %c0_i32_0 : i32, i32
  }
  func.func @transform_3(%arg0: i32, %arg1: i32, %arg2: i32, %arg3: i32) -> (i32, i32) {
    %c0_i32 = arith.constant 0 : i32
    %c0_i32_0 = arith.constant 0 : i32
    %c0_i32_1 = arith.constant 0 : i32
    return %c0_i32, %c0_i32_0 : i32, i32
  }
  func.func @transform_4(%arg0: i32, %arg1: i32, %arg2: i32, %arg3: i32) -> (i32, i32) {
    %c0_i32 = arith.constant 0 : i32
    %c0_i32_0 = arith.constant 0 : i32
    %c0_i32_1 = arith.constant 0 : i32
    return %c0_i32, %c0_i32_0 : i32, i32
  }
  func.func @transform_5(%arg0: i32, %arg1: i32, %arg2: i32, %arg3: i32) -> (i32, i32) {
    %c0_i32 = arith.constant 0 : i32
    %c0_i32_0 = arith.constant 0 : i32
    return %c0_i32, %arg3 : i32, i32
  }
  func.func @transform_6(%arg0: i32, %arg1: i32, %arg2: i32, %arg3: i32) -> (i32, i32) {
    %c0_i32 = arith.constant 0 : i32
    %c0_i32_0 = arith.constant 0 : i32
    return %c0_i32, %arg3 : i32, i32
  }
  func.func @transform_7(%arg0: i32, %arg1: i32, %arg2: i32, %arg3: i32) -> (i32, i32, i32, i32) {
    %c0_i32 = arith.constant 0 : i32
    return %arg0, %arg1, %arg2, %arg3 : i32, i32, i32, i32
  }
}

</mosaic_0001>

<bundles_post_ra>
// kernel: tpu_custom_call.1
= control target key start
LH: loop header
LB: loop body
LE: loop exit
PB: predicated region body
PF: predicated region fallthrough
CT: control target
= control target key end

     0   :  { %s1813_s0 = inlined_call_operand.hbm [shape: bf16[2,8,32], index: 0, kind: input, shape index: {}]   ;;  %s1814_s1 = inlined_call_operand.hbm [shape: bf16[2,8,32], index: 1, kind: input, shape index: {}]   ;;  %s1815_s2 = inlined_call_operand.hbm [shape: bf16[32,32], index: 2, kind: input, shape index: {}]   ;;  %s1816_s3 = inlined_call_operand.hbm [shape: bf16[32,32], index: 3, kind: input, shape index: {}]   ;;  %s1817_s4 = inlined_call_operand.vmem [shape: f32[1,32], index: 4, kind: input, shape index: {}]   ;;  %s1818_s5 = inlined_call_operand.hbm [shape: bf16[32,128], index: 5, kind: input, shape index: {}]   ;;  %s1819_s6 = inlined_call_operand.vmem [shape: f32[1,128], index: 6, kind: input, shape index: {}]   ;;  %s1820_s7 = inlined_call_operand.hbm [shape: bf16[2,8,8,128], index: 7, kind: output, shape index: {}]  }
   0x1   :  { %1824 = sst [smem:[#allocation20_spill]] %s1813_s0 }
   0x2   :  { %1825 = sst [smem:[#allocation21_spill]] %s1815_s2 }
   0x3   :  { %1826 = sst [smem:[#allocation22_spill]] %s1816_s3 }
   0x4   :  { %1827 = sst [smem:[#allocation23_spill]] %s1818_s5 }
   0x5   :  { %12 = vsyncpa [#allocation5], 0 }
   0x6   :  { %14 = vsyncpa [#allocation5 + $0x1], 0 }
   0x7   :  { %15 = vsyncpa [#allocation8], 0 }
   0x8   :  { %17 = vsyncpa [#allocation8 + $0x1], 0 }
   0x9   :  { %18 = vsyncpa [#allocation11], 0 }
   0xa   :  { %19 = vsyncpa [#allocation6], 0 }
   0xb   :  { %21 = vsyncpa [#allocation6 + $0x1], 0  ;;  %s1575_s24 = smov 0   ;;  %s1577_s25 = smov 0  }
   0xc   :  { %s1579_s26 = smov 0   ;;  %s1581_s27 = smov 0  }
   0xd   :  { %s1583_s28 = smov 0   ;;  %s1585_s29 = smov 0  }
   0xe LB: > { %s1606_s30 = sadd.s32 4294967295, %s1520_s29   ;;  %s1054_s8 = sadd.s32 4294967294, %s1520_s29   ;;  %s1520_s29 = sphi %s1585_s29, %s27_s29   ;;  %s1516_s28 = sphi %s1583_s28, %s1852_s28   ;;  %s1512_s27 = sphi %s1581_s27, %s1851_s27   ;;  %s1508_s26 = sphi %s1579_s26, %s1850_s26   ;;  %s1504_s25 = sphi %s1577_s25, %s1849_s25   ;;  %s1500_s24 = sphi %s1575_s24, %s1848_s24  }
   0xf   : > { %p75_p0 = scmp.ne.s32.totalorder %s1504_s25, %s1500_s24  ;;  %p1821_p1 = scmp.eq.s32.totalorder %s1606_s30, 0 }
  0x10   : > { %p254_p3 = scmp.eq.s32.totalorder %s1054_s8, 1  ;;  %p1055_p5 = scmp.ge.s32.totalorder %s1520_s29, 1 }
  0x11   : > { %p1615_p4 = por %p1821_p1, %p75_p0  ;;  %p261_p7 = scmp.lt.s32.totalorder %s1520_s29, 3 }
  0x12   : > { %p1620_p6 = por %p254_p3, %p75_p0  ;;  %s1522_s12 = smov [#allocation9]  }
  0x13   : > { %s1828_s9 = scalar_select %p1615_p4, 1, 0 }
  0x14   : > { %s1829_s10 = scalar_select %p1620_p6, 1, 0 }
  0x15   : > { %p1625_p8 = pnand %p1055_p5, %p261_p7  ;;  %s273_s13 = sshll.u32 %s1522_s12, 4  ;;  %s274_s13 = int_to_ptr.vmem [resolvable:$true] %s273_s13 }
  0x16   : > { %s1523_s15 = smov [#allocation10]   ;;  %s1524_s17 = smov [#allocation12]  }
  0x17   : > { %p1181_p9 = pneg %p1625_p8  ;;  %s286_s16 = sshll.u32 %s1523_s15, 4  ;;  %s287_s16 = int_to_ptr.vmem [resolvable:$true] %s286_s16 }
  0x18   : > { %s304_s18 = sshll.u32 %s1524_s17, 4  ;;  %s1305_s19 = scalar_lea.vmem %s274_s13, 256  ;;  %s305_s18 = int_to_ptr.vmem [resolvable:$true] %s304_s18 }
  0x19   : > { %p1634_p11 = pnand %p1181_p9, %p1821_p1  ;;  %p1306_p13 = scmp.ne.s32.totalorder %s274_s13, %s1305_s19 }
  0x1a   : > { %p1313_p5 = scmp.lt.s32.totalorder %s274_s13, %s274_s13  ;;  %p1314_p7 = scmp.lt.s32.totalorder %s1305_s19, %s1305_s19 }
  0x1b   : > { %p1296_p12 = pneg %p1634_p11 }
  0x1c   : > { %p1315_p9 = por %p1314_p7, %p1313_p5 }
  0x1d   : > { %p1308_p0 = pnand %p1306_p13, %p1296_p12 }
  0x1f   : > { %p1309_p3 = pneg %p1308_p0 }
  0x21   : > { %p1316_p10 = pnand %p1315_p9, %p1309_p3 }
  0x23   : > { %1319 = shalt.err (!%p1316_p10)
}
  0x24   : > { %s1525_s20 = smov 64   ;;  %s1526_s21 = smov 4  }
  0x25   : > { %s1832_s2 = sld [smem:[#allocation21_spill]]  ;;  %s1331_s8 = scalar_lea.vmem %s287_s16, 256 }
  0x26   : > { %p1332_p1 = scmp.ne.s32.totalorder %s287_s16, %s1331_s8  ;;  %p1339_p2 = scmp.lt.s32.totalorder %s287_s16, %s287_s16 }
  0x27   : > { %p1340_p6 = scmp.lt.s32.totalorder %s1331_s8, %s1331_s8 }
  0x28   : > { %p1334_p13 = pnand %p1332_p1, %p1296_p12 }
  0x29   : > { %p1341_p5 = por %p1340_p6, %p1339_p2 }
  0x2a   : > { %p1335_p0 = pneg %p1334_p13 }
  0x2b   : > { %1184 = dma.hbm_to_vmem [thread:$0]  (!%p1634_p11), %s1832_s2, 256, %s274_s13, [#allocation8], %s1525_s20, %s1525_s20, %s1526_s21  }
  0x2c   : > { %p1342_p3 = pnand %p1341_p5, %p1335_p0 }
  0x2e   : > { %1345 = shalt.err (!%p1342_p3)
}
  0x2f   : > { %s1833_s3 = sld [smem:[#allocation22_spill]]  ;;  %s1357_s13 = scalar_lea.vmem %s305_s18, 256 }
  0x30   : > { %p1358_p10 = scmp.ne.s32.totalorder %s305_s18, %s1357_s13  ;;  %p1365_p9 = scmp.lt.s32.totalorder %s305_s18, %s305_s18 }
  0x31   : > { %p1366_p13 = scmp.lt.s32.totalorder %s1357_s13, %s1357_s13 }
  0x32   : > { %p1360_p7 = pnand %p1358_p10, %p1296_p12 }
  0x33   : > { %p1367_p4 = por %p1366_p13, %p1365_p9 }
  0x34   : > { %p1361_p1 = pneg %p1360_p7 }
  0x35   : > { %1187 = dma.hbm_to_vmem [thread:$0]  (!%p1634_p11), %s1833_s3, 256, %s287_s16, [#allocation11], %s1525_s20, %s1525_s20, %s1526_s21  }
  0x36   : > { %p1368_p2 = pnand %p1367_p4, %p1361_p1 }
  0x38   : > { %1371 = shalt.err (!%p1368_p2)
}
  0x39   : > { %s1834_s5 = sld [smem:[#allocation23_spill]]  ;;  %s62_s16 = sadd.s32 1, %s1508_s26 }
  0x3a   : > { %s53_s22 = sadd.s32 1, %s1516_s28  ;;  %p69_p4 = scmp.ne.s32.totalorder %s1508_s26, %s1504_s25 }
  0x3b   : > { %p55_p6 = scmp.ge.s32.totalorder %s53_s22, 2  ;;  %p70_p12 = scmp.eq.s32.totalorder %s1520_s29, 0 }
  0x3c   : > { %p1835_p0 = scmp.eq.s32.totalorder %s1606_s30, 1  ;;  %p1205_p3 = scmp.lt.s32.totalorder %s1520_s29, 2 }
  0x3d   : > { %s1854_s22 = smov (%p55_p6, %s53_s22), 0  ;;  %p71_p10 = por %p70_p12, %p69_p4 }
  0x3e   : > { %p1671_p5 = por %p1835_p0, %p69_p4  ;;  %1837 = sst [smem:[#allocation19_spill]] %s1854_s22 }
  0x3f   : > { %1190 = dma.hbm_to_vmem [thread:$0]  (!%p1634_p11), %s1834_s5, 256, %s305_s18, [#allocation11], %s1525_s20, %s1525_s20, %s1526_s21  }
  0x40   : > { %s324_s23 = sand.u32 1, %s1508_s26   ;;  %s57_s8 = ssub.s32 %s1516_s28, %s1854_s22 }
  0x41   : > { %p60_p11 = scmp.eq.s32.totalorder %s57_s8, 0  ;;  %s1061_s18 = sshll.u32 %s324_s23, 2 }
  0x42   : > { %s1062_s20 = sshll.u32 %s1516_s28, 6  ;;  %s1838_s0 = sld [smem:[#allocation20_spill]] }
  0x43   : > { %s1683_s21 = scalar_select %p60_p11, %s1508_s26, %s62_s16  }
  0x44   : > { %s328_s17 = scalar_lea.vmem [#allocation4], %s1061_s18  ;;  %p1690_p7 = pnand %p1205_p3, %p71_p10 }
  0x45   : > { %s336_s19 = sshll.u32 %s328_s17, 4  ;;  %s1697_s8 = scalar_lea.hbm %s1814_s1, %s1062_s20  ;;  %s337_s19 = int_to_ptr.vmem [resolvable:$true] %s336_s19 }
  0x46   : > { %s343_s16 = sand.u32 1, %s1520_s29   ;;  %s325_s22 = scalar_lea.sflag [#allocation5], %s324_s23 }
  0x47   : > { %p1374_p1 = pneg %p1690_p7  ;;  %s1385_s12 = scalar_lea.vmem %s337_s19, 64 }
  0x48   : > { %s334_s13 = scalar_lea.hbm %s1838_s0, %s1062_s20  ;;  %p1386_p9 = scmp.ne.s32.totalorder %s337_s19, %s1385_s12 }
  0x49   : > { %s1527_s15 = smov [#allocation4]  }
  0x4a   : > { %p1388_p13 = pnand %p1386_p9, %p1374_p1  ;;  %s1390_s17 = sshll.u32 %s1527_s15, 4  ;;  %s1391_s17 = int_to_ptr.vmem [resolvable:$false] %s1390_s17 }
  0x4b   : > { %s1392_s0 = scalar_lea.vmem %s1391_s17, 128  ;;  %p1393_p4 = scmp.lt.s32.totalorder %s337_s19, %s1391_s17 }
  0x4c   : > { %p1389_p2 = pneg %p1388_p13  ;;  %p1394_p6 = scmp.lt.s32.totalorder %s1392_s0, %s1385_s12 }
  0x4e   : > { %p1395_p12 = por %p1394_p6, %p1393_p4 }
  0x50   : > { %p1396_p0 = pnand %p1395_p12, %p1389_p2 }
  0x52   : > { %1399 = shalt.err (!%p1396_p0)
}
  0x53   : > { %1194 = dma.hbm_to_vmem [thread:$0]  (!%p1690_p7), %s334_s13, 64, %s337_s19, %s325_s22  }
  0x54   : > { %s347_s3 = scalar_lea.vmem [#allocation7], %s1061_s18  ;;  %s344_s23 = scalar_lea.sflag [#allocation8], %s343_s16 }
  0x55   : > { %s355_s5 = sshll.u32 %s347_s3, 4  ;;  %s1528_s15 = smov [#allocation7]   ;;  %s356_s5 = int_to_ptr.vmem [resolvable:$true] %s355_s5 }
  0x56   : > { %s1413_s20 = scalar_lea.vmem %s356_s5, 64  ;;  %s1418_s17 = sshll.u32 %s1528_s15, 4  ;;  %s1419_s17 = int_to_ptr.vmem [resolvable:$false] %s1418_s17 }
  0x57   : > { %p1414_p3 = scmp.ne.s32.totalorder %s356_s5, %s1413_s20  ;;  %s1420_s0 = scalar_lea.vmem %s1419_s17, 128 }
  0x58   : > { %p1421_p9 = scmp.lt.s32.totalorder %s356_s5, %s1419_s17  ;;  %p1422_p13 = scmp.lt.s32.totalorder %s1420_s0, %s1413_s20 }
  0x59   : > { %p1416_p10 = pnand %p1414_p3, %p1374_p1 }
  0x5a   : > { %p1423_p2 = por %p1422_p13, %p1421_p9 }
  0x5b   : > { %p1417_p11 = pneg %p1416_p10 }
  0x5d   : > { %p1424_p4 = pnand %p1423_p2, %p1417_p11 }
  0x5f   : > { %1427 = shalt.err (!%p1424_p4)
}
  0x60   : > { %1197 = dma.hbm_to_vmem [thread:$0]  (!%p1690_p7), %s1697_s8, 64, %s356_s5, %s344_s23  }
  0x61   : > { %364 = sbr.rel (%p1625_p8) target bundleno = 594 (0x252), region = 48  ;;  %s1716_s22 = sand.u32 (!%p1625_p8), 1, %s1504_s25  }
  0x62   : > { %s1066_s18 = sshll.u32 (!%p1625_p8), %s1716_s22, 2  ;;  %s367_s13 = scalar_lea.sflag (!%p1625_p8), [#allocation5], %s1716_s22 }
  0x63   : > { %s370_s19 = scalar_lea.vmem (!%p1625_p8), [#allocation4], %s1066_s18  ;;  %p1840_p1 = scmp.ne.s32.totalorder (!%p1625_p8), %s1828_s9, 0 }
  0x66   : > { %1479 = dma.done.wait (%p1840_p1), %s367_s13, 64  }
  0x67   : > { %1481 = vsyncadd (%p1840_p1), %s367_s13, 4294967232  ;;  %s375_s2 = sand.u32 1, %s1606_s30   ;;  %s379_s11 = scalar_lea.vmem [#allocation7], %s1066_s18 }
  0x68   : > { %s376_s8 = scalar_lea.sflag [#allocation8], %s375_s2 }
  0x69   : > { %1483 = dma.done.wait (%p1840_p1), %s376_s8, 64  }
  0x6a   : > { %1485 = vsyncadd (%p1840_p1), %s376_s8, 4294967232  ;;  %p1841_p8 = scmp.eq.s32.totalorder %s1606_s30, 0 }
  0x6c   : > { %1487 = dma.done.wait (%p1841_p8), [#allocation8], 256   ;;  %p1842_p7 = pmov %p1841_p8 }
  0x6e   : > { %1489 = vsyncadd (%p1842_p7), [#allocation8], 4294967040  ;;  %p1843_p6 = pmov %p1842_p7 }
  0x70   : > { %1491 = dma.done.wait (%p1843_p6), [#allocation11], 512   ;;  %p1844_p12 = pmov %p1843_p6 }
  0x71   : > { %v1529_v0 = vmov 0.0   ;;  %vm1530_vm0 = vmmov 0   ;;  %v1268_v1 = vld [vmem:[#allocation9 + $0x8] sm:$0xff]   ;;  %v1269_v2 = vld [vmem:[#allocation9] sm:$0xff]   ;;  %v441_v3 = vld [vmem:[%s370_s19] sm:$0xf]  ;;  %v581_v14 = vlaneseq }
  0x72   : > { %1493 = vsyncadd (%p1844_p12), [#allocation11], 4294966784  ;;  %1135 = vmatprep.subr.bf16.mxu1 %v1529_v0  ;;  %1139 = vmatprep.mubr.msk.bf16.mxu1 %vm1530_vm0, %v1529_v0  ;;  %vm465_vm1 = vcmask 261120   ;;  %v1270_v4 = vld [vmem:[#allocation10 + $0x8] sm:$0xff]   ;;  %v1271_v5 = vld [vmem:[#allocation10] sm:$0xff]   ;;  %vm722_vm2 = vcmask 257024  }
  0x73   : > { %1136 = vmatpush3.bf16.msra.mxu1 %v1268_v1  ;;  %v513_v6 = vld [vmem:[%s379_s11] sm:$0xf]  ;;  %v1272_v7 = vld [vmem:[#allocation12 + $0x8] sm:$0xff]   ;;  %v1273_v8 = vld [vmem:[#allocation12] sm:$0xff]   ;;  %v1531_v12 = vmov 1966171168  }
  0x74   : > { %1137 = vmatprep.subr.bf16.mxu1 %v1529_v0  ;;  %1151 = vmatprep.subr.bf16.mxu0 %v1272_v7  ;;  %v1072_v9 = vld [vmem:[%s1817_s4] ss:$0 sm:$0xff]  ;;  %v579_v13 = vunpack.c.l.s4 %v1531_v12  ;;  %v582_v18 = vshrl.u32 %v581_v14, 7  ;;  %s1071_s3 = sshll.u32 %s1716_s22, 5  ;;  %s1099_s20 = sshll.u32 %s1512_s27, 9 }
  0x75   : > { %1152 = vmatpush3.bf16.msra.mxu0 %v1272_v7  ;;  %s429_s5 = scalar_lea.vmem [#allocation13], %s1071_s3  ;;  %s1765_s0 = scalar_lea.hbm %s1820_s7, %s1099_s20 }
  0x76   : > { %1153 = vmatprep.subr.bf16.mxu0 %v1273_v8  ;;  %v580_v17 = vunpack.c.0.s8 %v579_v13  ;;  %v620_v30 = vsub.s32 0, %v582_v18  ;;  %s894_s23 = sshll.u32 %s429_s5, 4  ;;  %s877_s18 = scalar_lea.sflag [#allocation6], %s1716_s22  ;;  %s1760_s23 = int_to_ptr.vmem [resolvable:$true] %s894_s23 }
  0x77   : > { %1138 = vmatpush3.bf16.msra.mxu1 %v1269_v2  ;;  %s1428_s13 = scalar_lea.vmem %s1760_s23, 512  ;;  %s1532_s27 = smov [#allocation13]  }
  0x78   : > { %1143 = vmatprep.subr.bf16.mxu1 %v1529_v0  ;;  %v583_v21 = vsub.s32 %v580_v17, %v582_v18  ;;  %p1429_p0 = scmp.ne.s32.totalorder %s1760_s23, %s1428_s13  ;;  %s1432_s19 = sshll.u32 %s1532_s27, 4  ;;  %s1433_s19 = int_to_ptr.vmem [resolvable:$false] %s1432_s19 }
  0x79   : > { %1154 = vmatpush3.bf16.msra.mxu0 %v1273_v8  ;;  %s1434_s2 = scalar_lea.vmem %s1433_s19, 1024  ;;  %p1435_p11 = scmp.lt.s32.totalorder %s1760_s23, %s1433_s19 }
  0x7a   : > { %1140 = vmatmul.mubr.msk.bf16.vlgmr.msra.gmra.mxu1 %vm465_vm1, %v441_v3  ;;  %p1430_p3 = pnand %p1429_p0, %p1671_p5  ;;  %p1436_p9 = scmp.lt.s32.totalorder %s1434_s2, %s1428_s13 }
  0x7b   : > { %1144 = vmatpush3.bf16.msra.mxu1 %v1270_v4  ;;  %1147 = vmatprep.mubr.msk.bf16.mxu1 %vm1530_vm0, %v1529_v0 }
  0x7c   : > { %1145 = vmatprep.subr.bf16.mxu1 %v1529_v0  ;;  %p1431_p10 = pneg %p1430_p3  ;;  %p1437_p13 = por %p1436_p9, %p1435_p11 }
  0x7e   : > { %p1438_p2 = pnand %p1437_p13, %p1431_p10 }
  0x7f   : > { %1146 = vmatpush3.bf16.msra.mxu1 %v1271_v5 }
  0x82   : > { %1148 = vmatmul.mubr.msk.bf16.vlgmr.msra.gmra.mxu1 %vm465_vm1, %v513_v6 }
 0x13a   : > { %v503_v10 = vpop.f32.mrf.mxu1 }
 0x13b   : > { %v504_v11 = vadd.f32 %v1072_v9, %v503_v10 }
 0x13c   : > { %v1141_v15 = vpop.f32.mrf.mxu1 }
 0x13d   : > { %509 = vst.msk [vmem:[#allocation2] sm:$0xff] %vm465_vm1, %v504_v11 }
 0x13e   : > { %v506_v16 = vpop.f32.mrf.mxu1 }
 0x140   : > { %v1142_v19 = vpop.f32.mrf.mxu1 }
 0x142   : > { %v568_v20 = vpop.f32.mrf.mxu1 }
 0x143   : > { %v576_v39 = vpack.c.bf16 %v568_v20, %v568_v20 }
 0x144   : > { %v574_v22 = vld [vmem:[#allocation2] sm:$0xff]  ;;  %v1149_v23 = vpop.f32.mrf.mxu1 }
 0x145   : > { %v575_v24 = vpack.c.bf16 %v574_v22, %v574_v22 }
 0x146   : > { %v571_v25 = vpop.f32.mrf.mxu1 }
 0x147   : > { %v584_v26 = vrot.slane %v575_v24, %v583_v21 }
 0x148   : > { %v1150_v27 = vpop.f32.mrf.mxu1 }
 0x149   : > { %v585_v28 = vcombine.high %v584_v26, %v584_v26  ;;  %v592_v29 = vrot.slane %v584_v26, %v583_v21 }
 0x14b   : > { %v599_v31 = vrot.slane %v585_v28, %v583_v21  ;;  %v600_v32 = vcombine.high %v592_v29, %v592_v29  ;;  %v603_v33 = vunpack.i.h.s16 %v592_v29  ;;  %v1079_v34 = vpack.i.b16 %v592_v29, %v592_v29  ;;  %v1083_v28 = vld [vmem:[%s1819_s6] ss:$0 sm:$0xff] }
 0x14d   : > { %v601_v35 = vcombine.high %v599_v31, %v599_v31  ;;  %v605_v36 = vunpack.i.h.s16 %v599_v31  ;;  %v607_v37 = vunpack.i.h.s16 %v600_v32  ;;  %v611_v38 = vpack.i.b16 %v603_v33, %v603_v33 }
 0x14e   : > { %v1080_v40 = vpack.i.b16 %v599_v31, %v599_v31  ;;  %v1081_v41 = vpack.i.b16 %v600_v32, %v600_v32  ;;  %v621_v42 = vrot.slane %v1079_v34, %v620_v30 }
 0x14f   : > { %v609_v43 = vunpack.i.h.s16 %v601_v35  ;;  %v613_v44 = vpack.i.b16 %v605_v36, %v605_v36  ;;  %v615_v45 = vpack.i.b16 %v607_v37, %v607_v37  ;;  %v1082_v46 = vpack.i.b16 %v601_v35, %v601_v35 }
 0x150   : > { %v625_v47 = vrot.slane %v611_v38, %v620_v30  ;;  %v629_v48 = vrot.slane %v1080_v40, %v620_v30  ;;  %v637_v49 = vrot.slane %v1081_v41, %v620_v30  ;;  %v651_v50 = vpack.i.b16 %v621_v42, %v621_v42 }
 0x151   : > { %v617_v51 = vpack.i.b16 %v609_v43, %v609_v43  ;;  %v633_v52 = vrot.slane %v613_v44, %v620_v30  ;;  %v641_v53 = vrot.slane %v615_v45, %v620_v30  ;;  %v645_v54 = vrot.slane %v1082_v46, %v620_v30 }
 0x152   : > { %v656_v55 = vrot.slane %v651_v50, %v620_v30  ;;  %v658_v56 = vpack.i.b16 %v625_v47, %v625_v47  ;;  %v665_v57 = vpack.i.b16 %v629_v48, %v629_v48  ;;  %v679_v58 = vpack.i.b16 %v637_v49, %v637_v49 }
 0x153   : > { %v649_v59 = vrot.slane %v617_v51, %v620_v30  ;;  %v672_v60 = vpack.i.b16 %v633_v52, %v633_v52  ;;  %v686_v61 = vpack.i.b16 %v641_v53, %v641_v53  ;;  %v693_v62 = vpack.i.b16 %v645_v54, %v645_v54 }
 0x154   : > { %v663_v63 = vrot.slane %v658_v56, %v620_v30  ;;  %v670_v0 = vrot.slane %v665_v57, %v620_v30  ;;  %v684_v1 = vrot.slane %v679_v58, %v620_v30  ;;  %v706_v2 = vadd.bf16 %v656_v55, %v576_v39 }
 0x155   : > { %v677_v3 = vrot.slane %v672_v60, %v620_v30  ;;  %v691_v4 = vrot.slane %v686_v61, %v620_v30  ;;  %v698_v5 = vrot.slane %v693_v62, %v620_v30  ;;  %v700_v6 = vpack.i.b16 %v649_v59, %v649_v59 }
 0x156   : > { %v707_v7 = vadd.bf16 %v663_v63, %v576_v39  ;;  %v708_v8 = vadd.bf16 %v670_v0, %v576_v39  ;;  %1278 = vtanh.bf16 %v706_v2  ;;  %v710_v11 = vadd.bf16 %v684_v1, %v576_v39 }
 0x157   : > { %v705_v9 = vrot.slane %v700_v6, %v620_v30  ;;  %v709_v10 = vadd.bf16 %v677_v3, %v576_v39  ;;  %v711_v12 = vadd.bf16 %v691_v4, %v576_v39  ;;  %v712_v13 = vadd.bf16 %v698_v5, %v576_v39 }
 0x158   : > { %1280 = vtanh.bf16 %v707_v7 }
 0x159   : > { %1282 = vtanh.bf16 %v708_v8  ;;  %v713_v14 = vadd.bf16 %v705_v9, %v576_v39 }
 0x15a   : > { %1284 = vtanh.bf16 %v709_v10 }
 0x15b   : > { %1286 = vtanh.bf16 %v710_v11 }
 0x15c   : > { %1288 = vtanh.bf16 %v711_v12 }
 0x15d   : > { %1290 = vtanh.bf16 %v712_v13 }
 0x15e   : > { %1292 = vtanh.bf16 %v713_v14 }
 0x164   : > { %v1279_v15 = vpop.eup %1278 }
 0x165   : > { %723 = vst.msk [vmem:[#allocation3] sm:$0xf] %vm722_vm2, %v1279_v15 }
 0x166   : > { %v1281_v16 = vpop.eup %1280 }
 0x167   : > { %v1283_v17 = vpop.eup %1282  ;;  %724 = vst.msk [vmem:[#allocation3 + $0x4] sm:$0xf] %vm722_vm2, %v1281_v16 }
 0x168   : > { %v1285_v18 = vpop.eup %1284  ;;  %725 = vst.msk [vmem:[#allocation3 + $0x8] sm:$0xf] %vm722_vm2, %v1283_v17 }
 0x169   : > { %v1287_v19 = vpop.eup %1286  ;;  %726 = vst.msk [vmem:[#allocation3 + $0xc] sm:$0xf] %vm722_vm2, %v1285_v18 }
 0x16a   : > { %v1289_v20 = vpop.eup %1288  ;;  %727 = vst.msk [vmem:[#allocation3 + $0x10] sm:$0xf] %vm722_vm2, %v1287_v19 }
 0x16b   : > { %v1291_v21 = vpop.eup %1290  ;;  %728 = vst.msk [vmem:[#allocation3 + $0x14] sm:$0xf] %vm722_vm2, %v1289_v20 }
 0x16c   : > { %v1293_v22 = vpop.eup %1292  ;;  %729 = vst.msk [vmem:[#allocation3 + $0x18] sm:$0xf] %vm722_vm2, %v1291_v21 }
 0x16d   : > { %730 = vst.msk [vmem:[#allocation3 + $0x1c] sm:$0xf] %vm722_vm2, %v1293_v22 }
 0x16e   : > { %v1274_v23 = vld [vmem:[#allocation3] sm:$0xff]  }
 0x16f   : > { %1155 = vmatprep.mubr.msk.bf16.mxu0 %vm465_vm1, %v1274_v23 }
 0x170   : > { %v1275_v24 = vld [vmem:[#allocation3 + $0x8] sm:$0xff]  }
 0x171   : > { %1156 = vmatmul.mubr.msk.bf16.vlgmr.msra.gmra.mxu0 %vm465_vm1, %v1275_v24 }
 0x172   : > { %v1276_v25 = vld [vmem:[#allocation3 + $0x10] sm:$0xff]  }
 0x173   : > { %1159 = vmatprep.mubr.msk.bf16.mxu0 %vm465_vm1, %v1276_v25 }
 0x174   : > { %v1277_v26 = vld [vmem:[#allocation3 + $0x18] sm:$0xff]  }
 0x179   : > { %1160 = vmatmul.mubr.msk.bf16.gmra.mxu0 %vm465_vm1, %v1277_v26 }
 0x231   : > { %v1157_v27 = vpop.f32.mrf.mxu0 }
 0x232   : > { %v838_v31 = vadd.f32 %v1157_v27, %v1083_v28 }
 0x233   : > { %v829_v29 = vpop.f32.mrf.mxu0 }
 0x234   : > { %v830_v34 = vadd.f32 %v1083_v28, %v829_v29 }
 0x235   : > { %v1158_v30 = vpop.f32.mrf.mxu0 }
 0x236   : > { %v841_v32 = vadd.f32 %v1158_v30, %v1083_v28 }
 0x237   : > { %v832_v33 = vpop.f32.mrf.mxu0 }
 0x238   : > { %v1108_v35 = vpack.c.bf16 %v841_v32, %v838_v31  ;;  %v833_v36 = vadd.f32 %v1083_v28, %v832_v33 }
 0x239   : > { %v1161_v37 = vpop.f32.mrf.mxu0 }
 0x23a   : > { %1120 = vst [vmem:[%s429_s5 + $0x8] sm:$0xff] %v1108_v35   ;;  %v1103_v38 = vpack.c.bf16 %v833_v36, %v830_v34  ;;  %v854_v41 = vadd.f32 %v1161_v37, %v1083_v28 }
 0x23b   : > { %v845_v39 = vpop.f32.mrf.mxu0 }
 0x23c   : > { %1104 = vst [vmem:[%s429_s5] sm:$0xff] %v1103_v38   ;;  %v846_v44 = vadd.f32 %v1083_v28, %v845_v39 }
 0x23d   : > { %v1162_v40 = vpop.f32.mrf.mxu0 }
 0x23e   : > { %v857_v42 = vadd.f32 %v1162_v40, %v1083_v28 }
 0x23f   : > { %v848_v43 = vpop.f32.mrf.mxu0 }
 0x240   : > { %v1118_v45 = vpack.c.bf16 %v857_v42, %v854_v41  ;;  %v849_v46 = vadd.f32 %v1083_v28, %v848_v43 }
 0x242   : > { %1122 = vst [vmem:[%s429_s5 + $0x18] sm:$0xff] %v1118_v45   ;;  %v1113_v47 = vpack.c.bf16 %v849_v46, %v846_v44 }
 0x244   : > { %1121 = vst [vmem:[%s429_s5 + $0x10] sm:$0xff] %v1113_v47  }
 0x245   : > { %1441 = shalt.err (!%p1438_p2)
}
 0x246   : > { %s1442_s8 = scalar_lea.hbm %s1765_s0, 512  ;;  %s1446_s9 = scalar_lea.hbm %s1820_s7, 1024 }
 0x247   : > { %p1443_p4 = scmp.ne.s32.totalorder %s1765_s0, %s1442_s8  ;;  %p1447_p7 = scmp.lt.s32.totalorder %s1765_s0, %s1820_s7 }
 0x248   : > { %p1448_p6 = scmp.lt.s32.totalorder %s1446_s9, %s1442_s8 }
 0x249   : > { %p1444_p1 = pnand %p1443_p4, %p1671_p5 }
 0x24a   : > { %p1449_p12 = por %p1448_p6, %p1447_p7 }
 0x24b   : > { %p1445_p8 = pneg %p1444_p1 }
 0x24d   : > { %p1450_p0 = pnand %p1449_p12, %p1445_p8 }
 0x24f   : > { %1453 = shalt.err (!%p1450_p0)
}
 0x250   : > { %s1533_s3 = smov 64   ;;  %s1534_s5 = smov 4  }
 0x251   : > { %1179 = dma.vmem_to_hbm [thread:$0]  (%p1671_p5), %s1760_s23, 512, %s1765_s0, %s877_s18, %s1533_s3, %s1533_s3, %s1534_s5  }
 0x252 PF: > { %s909_s20 = sand.u32 1, %s1500_s24   ;;  %p1845_p3 = scmp.ne.s32.totalorder %s1829_s10, 0 }
 0x253   : > { %p1846_p10 = scmp.ge.s32.totalorder %s1520_s29, 2  ;;  %s910_s15 = scalar_lea.sflag [#allocation6], %s909_s20 }
 0x255   : > { %p1199_p11 = pnand %p1846_p10, %p1845_p3 }
 0x257   : > { %p1200_p9 = pneg %p1199_p11 }
 0x259   : > { %1495 = dma.done.wait (%p1200_p9), %s910_s15, 512  }
 0x25a   : > { %1497 = vsyncadd (%p1200_p9), %s910_s15, 4294966784  ;;  %s27_s29 = sadd.s32 1, %s1520_s29   ;;  %s1847_s14 = sld [smem:[#allocation19_spill]] }
 0x25b   : > { %p24_p13 = scmp.ge.s32.totalorder %s27_s29, 4   ;;  %s1848_s24 = smov %s1504_s25 }
 0x25c   : > { %s1849_s25 = smov %s1508_s26  ;;  %s1850_s26 = smov %s1683_s21 }
 0x25d   : > { %s1851_s27 = smov %s1516_s28  ;;  %26 = sbr.rel (!%p24_p13) target bundleno = 14 (0xe), region = 130 }
 0x260   : > { %s1852_s28 = smov %s1847_s14 }
 0x262   :  { %915 = vsyncpa [#allocation5], 1 }
 0x263   :  { %917 = vsyncpa [#allocation5 + $0x1], 1 }
 0x264   :  { %918 = vsyncpa [#allocation8], 1 }
 0x265   :  { %920 = vsyncpa [#allocation8 + $0x1], 1 }
 0x266   :  { %921 = vsyncpa [#allocation11], 1 }
 0x267   :  { %922 = vsyncpa [#allocation6], 1 }
 0x268   :  { %924 = vsyncpa [#allocation6 + $0x1], 1 }

// kernel: tpu_custom_call.1
= control target key start
LH: loop header
LB: loop body
LE: loop exit
PB: predicated region body
PF: predicated region fallthrough
CT: control target
= control target key end

     0   :  { %s1813_s0 = inlined_call_operand.hbm [shape: bf16[2,8,32], index: 0, kind: input, shape index: {}]   ;;  %s1814_s1 = inlined_call_operand.hbm [shape: bf16[2,8,32], index: 1, kind: input, shape index: {}]   ;;  %s1815_s2 = inlined_call_operand.hbm [shape: bf16[32,32], index: 2, kind: input, shape index: {}]   ;;  %s1816_s3 = inlined_call_operand.hbm [shape: bf16[32,32], index: 3, kind: input, shape index: {}]   ;;  %s1817_s4 = inlined_call_operand.vmem [shape: f32[1,32], index: 4, kind: input, shape index: {}]   ;;  %s1818_s5 = inlined_call_operand.hbm [shape: bf16[32,128], index: 5, kind: input, shape index: {}]   ;;  %s1819_s6 = inlined_call_operand.vmem [shape: f32[1,128], index: 6, kind: input, shape index: {}]   ;;  %s1820_s7 = inlined_call_operand.hbm [shape: bf16[2,8,8,128], index: 7, kind: output, shape index: {}]  }
   0x1   :  { %1824 = sst [smem:[#allocation20_spill]] %s1813_s0 }
   0x2   :  { %1825 = sst [smem:[#allocation21_spill]] %s1815_s2 }
   0x3   :  { %1826 = sst [smem:[#allocation22_spill]] %s1816_s3 }
   0x4   :  { %1827 = sst [smem:[#allocation23_spill]] %s1818_s5 }
   0x5   :  { %12 = vsyncpa [#allocation5], 0 }
   0x6   :  { %14 = vsyncpa [#allocation5 + $0x1], 0 }
   0x7   :  { %15 = vsyncpa [#allocation8], 0 }
   0x8   :  { %17 = vsyncpa [#allocation8 + $0x1], 0 }
   0x9   :  { %18 = vsyncpa [#allocation11], 0 }
   0xa   :  { %19 = vsyncpa [#allocation6], 0 }
   0xb   :  { %21 = vsyncpa [#allocation6 + $0x1], 0  ;;  %s1575_s24 = smov 0   ;;  %s1577_s25 = smov 0  }
   0xc   :  { %s1579_s26 = smov 0   ;;  %s1581_s27 = smov 0  }
   0xd   :  { %s1583_s28 = smov 0   ;;  %s1585_s29 = smov 0  }
   0xe LB: > { %s1606_s30 = sadd.s32 4294967295, %s1520_s29   ;;  %s1054_s8 = sadd.s32 4294967294, %s1520_s29   ;;  %s1520_s29 = sphi %s1585_s29, %s27_s29   ;;  %s1516_s28 = sphi %s1583_s28, %s1852_s28   ;;  %s1512_s27 = sphi %s1581_s27, %s1851_s27   ;;  %s1508_s26 = sphi %s1579_s26, %s1850_s26   ;;  %s1504_s25 = sphi %s1577_s25, %s1849_s25   ;;  %s1500_s24 = sphi %s1575_s24, %s1848_s24  }
   0xf   : > { %p75_p0 = scmp.ne.s32.totalorder %s1504_s25, %s1500_s24  ;;  %p1821_p1 = scmp.eq.s32.totalorder %s1606_s30, 0 }
  0x10   : > { %p254_p3 = scmp.eq.s32.totalorder %s1054_s8, 1  ;;  %p1055_p5 = scmp.ge.s32.totalorder %s1520_s29, 1 }
  0x11   : > { %p1615_p4 = por %p1821_p1, %p75_p0  ;;  %p261_p7 = scmp.lt.s32.totalorder %s1520_s29, 3 }
  0x12   : > { %p1620_p6 = por %p254_p3, %p75_p0  ;;  %s1522_s12 = smov [#allocation9]  }
  0x13   : > { %s1828_s9 = scalar_select %p1615_p4, 1, 0 }
  0x14   : > { %s1829_s10 = scalar_select %p1620_p6, 1, 0 }
  0x15   : > { %p1625_p8 = pnand %p1055_p5, %p261_p7  ;;  %s273_s13 = sshll.u32 %s1522_s12, 4  ;;  %s274_s13 = int_to_ptr.vmem [resolvable:$true] %s273_s13 }
  0x16   : > { %s1523_s15 = smov [#allocation10]   ;;  %s1524_s17 = smov [#allocation12]  }
  0x17   : > { %p1181_p9 = pneg %p1625_p8  ;;  %s286_s16 = sshll.u32 %s1523_s15, 4  ;;  %s287_s16 = int_to_ptr.vmem [resolvable:$true] %s286_s16 }
  0x18   : > { %s304_s18 = sshll.u32 %s1524_s17, 4  ;;  %s1305_s19 = scalar_lea.vmem %s274_s13, 256  ;;  %s305_s18 = int_to_ptr.vmem [resolvable:$true] %s304_s18 }
  0x19   : > { %p1634_p11 = pnand %p1181_p9, %p1821_p1  ;;  %p1306_p13 = scmp.ne.s32.totalorder %s274_s13, %s1305_s19 }
  0x1a   : > { %p1313_p5 = scmp.lt.s32.totalorder %s274_s13, %s274_s13  ;;  %p1314_p7 = scmp.lt.s32.totalorder %s1305_s19, %s1305_s19 }
  0x1b   : > { %p1296_p12 = pneg %p1634_p11 }
  0x1c   : > { %p1315_p9 = por %p1314_p7, %p1313_p5 }
  0x1d   : > { %p1308_p0 = pnand %p1306_p13, %p1296_p12 }
  0x1f   : > { %p1309_p3 = pneg %p1308_p0 }
  0x21   : > { %p1316_p10 = pnand %p1315_p9, %p1309_p3 }
  0x23   : > { %1319 = shalt.err (!%p1316_p10)
}
  0x24   : > { %s1525_s20 = smov 64   ;;  %s1526_s21 = smov 4  }
  0x25   : > { %s1832_s2 = sld [smem:[#allocation21_spill]]  ;;  %s1331_s8 = scalar_lea.vmem %s287_s16, 256 }
  0x26   : > { %p1332_p1 = scmp.ne.s32.totalorder %s287_s16, %s1331_s8  ;;  %p1339_p2 = scmp.lt.s32.totalorder %s287_s16, %s287_s16 }
  0x27   : > { %p1340_p6 = scmp.lt.s32.totalorder %s1331_s8, %s1331_s8 }
  0x28   : > { %p1334_p13 = pnand %p1332_p1, %p1296_p12 }
  0x29   : > { %p1341_p5 = por %p1340_p6, %p1339_p2 }
  0x2a   : > { %p1335_p0 = pneg %p1334_p13 }
  0x2b   : > { %1184 = dma.hbm_to_vmem [thread:$0]  (!%p1634_p11), %s1832_s2, 256, %s274_s13, [#allocation8], %s1525_s20, %s1525_s20, %s1526_s21  }
  0x2c   : > { %p1342_p3 = pnand %p1341_p5, %p1335_p0 }
  0x2e   : > { %1345 = shalt.err (!%p1342_p3)
}
  0x2f   : > { %s1833_s3 = sld [smem:[#allocation22_spill]]  ;;  %s1357_s13 = scalar_lea.vmem %s305_s18, 256 }
  0x30   : > { %p1358_p10 = scmp.ne.s32.totalorder %s305_s18, %s1357_s13  ;;  %p1365_p9 = scmp.lt.s32.totalorder %s305_s18, %s305_s18 }
  0x31   : > { %p1366_p13 = scmp.lt.s32.totalorder %s1357_s13, %s1357_s13 }
  0x32   : > { %p1360_p7 = pnand %p1358_p10, %p1296_p12 }
  0x33   : > { %p1367_p4 = por %p1366_p13, %p1365_p9 }
  0x34   : > { %p1361_p1 = pneg %p1360_p7 }
  0x35   : > { %1187 = dma.hbm_to_vmem [thread:$0]  (!%p1634_p11), %s1833_s3, 256, %s287_s16, [#allocation11], %s1525_s20, %s1525_s20, %s1526_s21  }
  0x36   : > { %p1368_p2 = pnand %p1367_p4, %p1361_p1 }
  0x38   : > { %1371 = shalt.err (!%p1368_p2)
}
  0x39   : > { %s1834_s5 = sld [smem:[#allocation23_spill]]  ;;  %s62_s16 = sadd.s32 1, %s1508_s26 }
  0x3a   : > { %s53_s22 = sadd.s32 1, %s1516_s28  ;;  %p69_p4 = scmp.ne.s32.totalorder %s1508_s26, %s1504_s25 }
  0x3b   : > { %p55_p6 = scmp.ge.s32.totalorder %s53_s22, 2  ;;  %p70_p12 = scmp.eq.s32.totalorder %s1520_s29, 0 }
  0x3c   : > { %p1835_p0 = scmp.eq.s32.totalorder %s1606_s30, 1  ;;  %p1205_p3 = scmp.lt.s32.totalorder %s1520_s29, 2 }
  0x3d   : > { %s1854_s22 = smov (%p55_p6, %s53_s22), 0  ;;  %p71_p10 = por %p70_p12, %p69_p4 }
  0x3e   : > { %p1671_p5 = por %p1835_p0, %p69_p4  ;;  %1837 = sst [smem:[#allocation19_spill]] %s1854_s22 }
  0x3f   : > { %1190 = dma.hbm_to_vmem [thread:$0]  (!%p1634_p11), %s1834_s5, 256, %s305_s18, [#allocation11], %s1525_s20, %s1525_s20, %s1526_s21  }
  0x40   : > { %s324_s23 = sand.u32 1, %s1508_s26   ;;  %s57_s8 = ssub.s32 %s1516_s28, %s1854_s22 }
  0x41   : > { %p60_p11 = scmp.eq.s32.totalorder %s57_s8, 0  ;;  %s1061_s18 = sshll.u32 %s324_s23, 2 }
  0x42   : > { %s1062_s20 = sshll.u32 %s1516_s28, 6  ;;  %s1838_s0 = sld [smem:[#allocation20_spill]] }
  0x43   : > { %s1683_s21 = scalar_select %p60_p11, %s1508_s26, %s62_s16  }
  0x44   : > { %s328_s17 = scalar_lea.vmem [#allocation4], %s1061_s18  ;;  %p1690_p7 = pnand %p1205_p3, %p71_p10 }
  0x45   : > { %s336_s19 = sshll.u32 %s328_s17, 4  ;;  %s1697_s8 = scalar_lea.hbm %s1814_s1, %s1062_s20  ;;  %s337_s19 = int_to_ptr.vmem [resolvable:$true] %s336_s19 }
  0x46   : > { %s343_s16 = sand.u32 1, %s1520_s29   ;;  %s325_s22 = scalar_lea.sflag [#allocation5], %s324_s23 }
  0x47   : > { %p1374_p1 = pneg %p1690_p7  ;;  %s1385_s12 = scalar_lea.vmem %s337_s19, 64 }
  0x48   : > { %s334_s13 = scalar_lea.hbm %s1838_s0, %s1062_s20  ;;  %p1386_p9 = scmp.ne.s32.totalorder %s337_s19, %s1385_s12 }
  0x49   : > { %s1527_s15 = smov [#allocation4]  }
  0x4a   : > { %p1388_p13 = pnand %p1386_p9, %p1374_p1  ;;  %s1390_s17 = sshll.u32 %s1527_s15, 4  ;;  %s1391_s17 = int_to_ptr.vmem [resolvable:$false] %s1390_s17 }
  0x4b   : > { %s1392_s0 = scalar_lea.vmem %s1391_s17, 128  ;;  %p1393_p4 = scmp.lt.s32.totalorder %s337_s19, %s1391_s17 }
  0x4c   : > { %p1389_p2 = pneg %p1388_p13  ;;  %p1394_p6 = scmp.lt.s32.totalorder %s1392_s0, %s1385_s12 }
  0x4e   : > { %p1395_p12 = por %p1394_p6, %p1393_p4 }
  0x50   : > { %p1396_p0 = pnand %p1395_p12, %p1389_p2 }
  0x52   : > { %1399 = shalt.err (!%p1396_p0)
}
  0x53   : > { %1194 = dma.hbm_to_vmem [thread:$0]  (!%p1690_p7), %s334_s13, 64, %s337_s19, %s325_s22  }
  0x54   : > { %s347_s3 = scalar_lea.vmem [#allocation7], %s1061_s18  ;;  %s344_s23 = scalar_lea.sflag [#allocation8], %s343_s16 }
  0x55   : > { %s355_s5 = sshll.u32 %s347_s3, 4  ;;  %s1528_s15 = smov [#allocation7]   ;;  %s356_s5 = int_to_ptr.vmem [resolvable:$true] %s355_s5 }
  0x56   : > { %s1413_s20 = scalar_lea.vmem %s356_s5, 64  ;;  %s1418_s17 = sshll.u32 %s1528_s15, 4  ;;  %s1419_s17 = int_to_ptr.vmem [resolvable:$false] %s1418_s17 }
  0x57   : > { %p1414_p3 = scmp.ne.s32.totalorder %s356_s5, %s1413_s20  ;;  %s1420_s0 = scalar_lea.vmem %s1419_s17, 128 }
  0x58   : > { %p1421_p9 = scmp.lt.s32.totalorder %s356_s5, %s1419_s17  ;;  %p1422_p13 = scmp.lt.s32.totalorder %s1420_s0, %s1413_s20 }
  0x59   : > { %p1416_p10 = pnand %p1414_p3, %p1374_p1 }
  0x5a   : > { %p1423_p2 = por %p1422_p13, %p1421_p9 }
  0x5b   : > { %p1417_p11 = pneg %p1416_p10 }
  0x5d   : > { %p1424_p4 = pnand %p1423_p2, %p1417_p11 }
  0x5f   : > { %1427 = shalt.err (!%p1424_p4)
}
  0x60   : > { %1197 = dma.hbm_to_vmem [thread:$0]  (!%p1690_p7), %s1697_s8, 64, %s356_s5, %s344_s23  }
  0x61   : > { %364 = sbr.rel (%p1625_p8) target bundleno = 594 (0x252), region = 48  ;;  %s1716_s22 = sand.u32 (!%p1625_p8), 1, %s1504_s25  }
  0x62   : > { %s1066_s18 = sshll.u32 (!%p1625_p8), %s1716_s22, 2  ;;  %s367_s13 = scalar_lea.sflag (!%p1625_p8), [#allocation5], %s1716_s22 }
  0x63   : > { %s370_s19 = scalar_lea.vmem (!%p1625_p8), [#allocation4], %s1066_s18  ;;  %p1840_p1 = scmp.ne.s32.totalorder (!%p1625_p8), %s1828_s9, 0 }
  0x66   : > { %1479 = dma.done.wait (%p1840_p1), %s367_s13, 64  }
  0x67   : > { %1481 = vsyncadd (%p1840_p1), %s367_s13, 4294967232  ;;  %s375_s2 = sand.u32 1, %s1606_s30   ;;  %s379_s11 = scalar_lea.vmem [#allocation7], %s1066_s18 }
  0x68   : > { %s376_s8 = scalar_lea.sflag [#allocation8], %s375_s2 }
  0x69   : > { %1483 = dma.done.wait (%p1840_p1), %s376_s8, 64  }
  0x6a   : > { %1485 = vsyncadd (%p1840_p1), %s376_s8, 4294967232  ;;  %p1841_p8 = scmp.eq.s32.totalorder %s1606_s30, 0 }
  0x6c   : > { %1487 = dma.done.wait (%p1841_p8), [#allocation8], 256   ;;  %p1842_p7 = pmov %p1841_p8 }
  0x6e   : > { %1489 = vsyncadd (%p1842_p7), [#allocation8], 4294967040  ;;  %p1843_p6 = pmov %p1842_p7 }
  0x70   : > { %1491 = dma.done.wait (%p1843_p6), [#allocation11], 512   ;;  %p1844_p12 = pmov %p1843_p6 }
  0x71   : > { %v1529_v0 = vmov 0.0   ;;  %vm1530_vm0 = vmmov 0   ;;  %v1268_v1 = vld [vmem:[#allocation9 + $0x8] sm:$0xff]   ;;  %v1269_v2 = vld [vmem:[#allocation9] sm:$0xff]   ;;  %v441_v3 = vld [vmem:[%s370_s19] sm:$0xf]  ;;  %v581_v14 = vlaneseq }
  0x72   : > { %1493 = vsyncadd (%p1844_p12), [#allocation11], 4294966784  ;;  %1135 = vmatprep.subr.bf16.mxu1 %v1529_v0  ;;  %1139 = vmatprep.mubr.msk.bf16.mxu1 %vm1530_vm0, %v1529_v0  ;;  %vm465_vm1 = vcmask 261120   ;;  %v1270_v4 = vld [vmem:[#allocation10 + $0x8] sm:$0xff]   ;;  %v1271_v5 = vld [vmem:[#allocation10] sm:$0xff]   ;;  %vm722_vm2 = vcmask 257024  }
  0x73   : > { %1136 = vmatpush3.bf16.msra.mxu1 %v1268_v1  ;;  %v513_v6 = vld [vmem:[%s379_s11] sm:$0xf]  ;;  %v1272_v7 = vld [vmem:[#allocation12 + $0x8] sm:$0xff]   ;;  %v1273_v8 = vld [vmem:[#allocation12] sm:$0xff]   ;;  %v1531_v12 = vmov 1966171168  }
  0x74   : > { %1137 = vmatprep.subr.bf16.mxu1 %v1529_v0  ;;  %1151 = vmatprep.subr.bf16.mxu0 %v1272_v7  ;;  %v1072_v9 = vld [vmem:[%s1817_s4] ss:$0 sm:$0xff]  ;;  %v579_v13 = vunpack.c.l.s4 %v1531_v12  ;;  %v582_v18 = vshrl.u32 %v581_v14, 7  ;;  %s1071_s3 = sshll.u32 %s1716_s22, 5  ;;  %s1099_s20 = sshll.u32 %s1512_s27, 9 }
  0x75   : > { %1152 = vmatpush3.bf16.msra.mxu0 %v1272_v7  ;;  %s429_s5 = scalar_lea.vmem [#allocation13], %s1071_s3  ;;  %s1765_s0 = scalar_lea.hbm %s1820_s7, %s1099_s20 }
  0x76   : > { %1153 = vmatprep.subr.bf16.mxu0 %v1273_v8  ;;  %v580_v17 = vunpack.c.0.s8 %v579_v13  ;;  %v620_v30 = vsub.s32 0, %v582_v18  ;;  %s894_s23 = sshll.u32 %s429_s5, 4  ;;  %s877_s18 = scalar_lea.sflag [#allocation6], %s1716_s22  ;;  %s1760_s23 = int_to_ptr.vmem [resolvable:$true] %s894_s23 }
  0x77   : > { %1138 = vmatpush3.bf16.msra.mxu1 %v1269_v2  ;;  %s1428_s13 = scalar_lea.vmem %s1760_s23, 512  ;;  %s1532_s27 = smov [#allocation13]  }
  0x78   : > { %1143 = vmatprep.subr.bf16.mxu1 %v1529_v0  ;;  %v583_v21 = vsub.s32 %v580_v17, %v582_v18  ;;  %p1429_p0 = scmp.ne.s32.totalorder %s1760_s23, %s1428_s13  ;;  %s1432_s19 = sshll.u32 %s1532_s27, 4  ;;  %s1433_s19 = int_to_ptr.vmem [resolvable:$false] %s1432_s19 }
  0x79   : > { %1154 = vmatpush3.bf16.msra.mxu0 %v1273_v8  ;;  %s1434_s2 = scalar_lea.vmem %s1433_s19, 1024  ;;  %p1435_p11 = scmp.lt.s32.totalorder %s1760_s23, %s1433_s19 }
  0x7a   : > { %1140 = vmatmul.mubr.msk.bf16.vlgmr.msra.gmra.mxu1 %vm465_vm1, %v441_v3  ;;  %p1430_p3 = pnand %p1429_p0, %p1671_p5  ;;  %p1436_p9 = scmp.lt.s32.totalorder %s1434_s2, %s1428_s13 }
  0x7b   : > { %1144 = vmatpush3.bf16.msra.mxu1 %v1270_v4  ;;  %1147 = vmatprep.mubr.msk.bf16.mxu1 %vm1530_vm0, %v1529_v0 }
  0x7c   : > { %1145 = vmatprep.subr.bf16.mxu1 %v1529_v0  ;;  %p1431_p10 = pneg %p1430_p3  ;;  %p1437_p13 = por %p1436_p9, %p1435_p11 }
  0x7e   : > { %p1438_p2 = pnand %p1437_p13, %p1431_p10 }
  0x7f   : > { %1146 = vmatpush3.bf16.msra.mxu1 %v1271_v5 }
  0x82   : > { %1148 = vmatmul.mubr.msk.bf16.vlgmr.msra.gmra.mxu1 %vm465_vm1, %v513_v6 }
 0x13a   : > { %v503_v10 = vpop.f32.mrf.mxu1 }
 0x13b   : > { %v504_v11 = vadd.f32 %v1072_v9, %v503_v10 }
 0x13c   : > { %v1141_v15 = vpop.f32.mrf.mxu1 }
 0x13d   : > { %509 = vst.msk [vmem:[#allocation2] sm:$0xff] %vm465_vm1, %v504_v11 }
 0x13e   : > { %v506_v16 = vpop.f32.mrf.mxu1 }
 0x140   : > { %v1142_v19 = vpop.f32.mrf.mxu1 }
 0x142   : > { %v568_v20 = vpop.f32.mrf.mxu1 }
 0x143   : > { %v576_v39 = vpack.c.bf16 %v568_v20, %v568_v20 }
 0x144   : > { %v574_v22 = vld [vmem:[#allocation2] sm:$0xff]  ;;  %v1149_v23 = vpop.f32.mrf.mxu1 }
 0x145   : > { %v575_v24 = vpack.c.bf16 %v574_v22, %v574_v22 }
 0x146   : > { %v571_v25 = vpop.f32.mrf.mxu1 }
 0x147   : > { %v584_v26 = vrot.slane %v575_v24, %v583_v21 }
 0x148   : > { %v1150_v27 = vpop.f32.mrf.mxu1 }
 0x149   : > { %v585_v28 = vcombine.high %v584_v26, %v584_v26  ;;  %v592_v29 = vrot.slane %v584_v26, %v583_v21 }
 0x14b   : > { %v599_v31 = vrot.slane %v585_v28, %v583_v21  ;;  %v600_v32 = vcombine.high %v592_v29, %v592_v29  ;;  %v603_v33 = vunpack.i.h.s16 %v592_v29  ;;  %v1079_v34 = vpack.i.b16 %v592_v29, %v592_v29  ;;  %v1083_v28 = vld [vmem:[%s1819_s6] ss:$0 sm:$0xff] }
 0x14d   : > { %v601_v35 = vcombine.high %v599_v31, %v599_v31  ;;  %v605_v36 = vunpack.i.h.s16 %v599_v31  ;;  %v607_v37 = vunpack.i.h.s16 %v600_v32  ;;  %v611_v38 = vpack.i.b16 %v603_v33, %v603_v33 }
 0x14e   : > { %v1080_v40 = vpack.i.b16 %v599_v31, %v599_v31  ;;  %v1081_v41 = vpack.i.b16 %v600_v32, %v600_v32  ;;  %v621_v42 = vrot.slane %v1079_v34, %v620_v30 }
 0x14f   : > { %v609_v43 = vunpack.i.h.s16 %v601_v35  ;;  %v613_v44 = vpack.i.b16 %v605_v36, %v605_v36  ;;  %v615_v45 = vpack.i.b16 %v607_v37, %v607_v37  ;;  %v1082_v46 = vpack.i.b16 %v601_v35, %v601_v35 }
 0x150   : > { %v625_v47 = vrot.slane %v611_v38, %v620_v30  ;;  %v629_v48 = vrot.slane %v1080_v40, %v620_v30  ;;  %v637_v49 = vrot.slane %v1081_v41, %v620_v30  ;;  %v651_v50 = vpack.i.b16 %v621_v42, %v621_v42 }
 0x151   : > { %v617_v51 = vpack.i.b16 %v609_v43, %v609_v43  ;;  %v633_v52 = vrot.slane %v613_v44, %v620_v30  ;;  %v641_v53 = vrot.slane %v615_v45, %v620_v30  ;;  %v645_v54 = vrot.slane %v1082_v46, %v620_v30 }
 0x152   : > { %v656_v55 = vrot.slane %v651_v50, %v620_v30  ;;  %v658_v56 = vpack.i.b16 %v625_v47, %v625_v47  ;;  %v665_v57 = vpack.i.b16 %v629_v48, %v629_v48  ;;  %v679_v58 = vpack.i.b16 %v637_v49, %v637_v49 }
 0x153   : > { %v649_v59 = vrot.slane %v617_v51, %v620_v30  ;;  %v672_v60 = vpack.i.b16 %v633_v52, %v633_v52  ;;  %v686_v61 = vpack.i.b16 %v641_v53, %v641_v53  ;;  %v693_v62 = vpack.i.b16 %v645_v54, %v645_v54 }
 0x154   : > { %v663_v63 = vrot.slane %v658_v56, %v620_v30  ;;  %v670_v0 = vrot.slane %v665_v57, %v620_v30  ;;  %v684_v1 = vrot.slane %v679_v58, %v620_v30  ;;  %v706_v2 = vadd.bf16 %v656_v55, %v576_v39 }
 0x155   : > { %v677_v3 = vrot.slane %v672_v60, %v620_v30  ;;  %v691_v4 = vrot.slane %v686_v61, %v620_v30  ;;  %v698_v5 = vrot.slane %v693_v62, %v620_v30  ;;  %v700_v6 = vpack.i.b16 %v649_v59, %v649_v59 }
 0x156   : > { %v707_v7 = vadd.bf16 %v663_v63, %v576_v39  ;;  %v708_v8 = vadd.bf16 %v670_v0, %v576_v39  ;;  %1278 = vtanh.bf16 %v706_v2  ;;  %v710_v11 = vadd.bf16 %v684_v1, %v576_v39 }
 0x157   : > { %v705_v9 = vrot.slane %v700_v6, %v620_v30  ;;  %v709_v10 = vadd.bf16 %v677_v3, %v576_v39  ;;  %v711_v12 = vadd.bf16 %v691_v4, %v576_v39  ;;  %v712_v13 = vadd.bf16 %v698_v5, %v576_v39 }
 0x158   : > { %1280 = vtanh.bf16 %v707_v7 }
 0x159   : > { %1282 = vtanh.bf16 %v708_v8  ;;  %v713_v14 = vadd.bf16 %v705_v9, %v576_v39 }
 0x15a   : > { %1284 = vtanh.bf16 %v709_v10 }
 0x15b   : > { %1286 = vtanh.bf16 %v710_v11 }
 0x15c   : > { %1288 = vtanh.bf16 %v711_v12 }
 0x15d   : > { %1290 = vtanh.bf16 %v712_v13 }
 0x15e   : > { %1292 = vtanh.bf16 %v713_v14 }
 0x164   : > { %v1279_v15 = vpop.eup %1278 }
 0x165   : > { %723 = vst.msk [vmem:[#allocation3] sm:$0xf] %vm722_vm2, %v1279_v15 }
 0x166   : > { %v1281_v16 = vpop.eup %1280 }
 0x167   : > { %v1283_v17 = vpop.eup %1282  ;;  %724 = vst.msk [vmem:[#allocation3 + $0x4] sm:$0xf] %vm722_vm2, %v1281_v16 }
 0x168   : > { %v1285_v18 = vpop.eup %1284  ;;  %725 = vst.msk [vmem:[#allocation3 + $0x8] sm:$0xf] %vm722_vm2, %v1283_v17 }
 0x169   : > { %v1287_v19 = vpop.eup %1286  ;;  %726 = vst.msk [vmem:[#allocation3 + $0xc] sm:$0xf] %vm722_vm2, %v1285_v18 }
 0x16a   : > { %v1289_v20 = vpop.eup %1288  ;;  %727 = vst.msk [vmem:[#allocation3 + $0x10] sm:$0xf] %vm722_vm2, %v1287_v19 }
 0x16b   : > { %v1291_v21 = vpop.eup %1290  ;;  %728 = vst.msk [vmem:[#allocation3 + $0x14] sm:$0xf] %vm722_vm2, %v1289_v20 }
 0x16c   : > { %v1293_v22 = vpop.eup %1292  ;;  %729 = vst.msk [vmem:[#allocation3 + $0x18] sm:$0xf] %vm722_vm2, %v1291_v21 }
 0x16d   : > { %730 = vst.msk [vmem:[#allocation3 + $0x1c] sm:$0xf] %vm722_vm2, %v1293_v22 }
 0x16e   : > { %v1274_v23 = vld [vmem:[#allocation3] sm:$0xff]  }
 0x16f   : > { %1155 = vmatprep.mubr.msk.bf16.mxu0 %vm465_vm1, %v1274_v23 }
 0x170   : > { %v1275_v24 = vld [vmem:[#allocation3 + $0x8] sm:$0xff]  }
 0x171   : > { %1156 = vmatmul.mubr.msk.bf16.vlgmr.msra.gmra.mxu0 %vm465_vm1, %v1275_v24 }
 0x172   : > { %v1276_v25 = vld [vmem:[#allocation3 + $0x10] sm:$0xff]  }
 0x173   : > { %1159 = vmatprep.mubr.msk.bf16.mxu0 %vm465_vm1, %v1276_v25 }
 0x174   : > { %v1277_v26 = vld [vmem:[#allocation3 + $0x18] sm:$0xff]  }
 0x179   : > { %1160 = vmatmul.mubr.msk.bf16.gmra.mxu0 %vm465_vm1, %v1277_v26 }
 0x231   : > { %v1157_v27 = vpop.f32.mrf.mxu0 }
 0x232   : > { %v838_v31 = vadd.f32 %v1157_v27, %v1083_v28 }
 0x233   : > { %v829_v29 = vpop.f32.mrf.mxu0 }
 0x234   : > { %v830_v34 = vadd.f32 %v1083_v28, %v829_v29 }
 0x235   : > { %v1158_v30 = vpop.f32.mrf.mxu0 }
 0x236   : > { %v841_v32 = vadd.f32 %v1158_v30, %v1083_v28 }
 0x237   : > { %v832_v33 = vpop.f32.mrf.mxu0 }
 0x238   : > { %v1108_v35 = vpack.c.bf16 %v841_v32, %v838_v31  ;;  %v833_v36 = vadd.f32 %v1083_v28, %v832_v33 }
 0x239   : > { %v1161_v37 = vpop.f32.mrf.mxu0 }
 0x23a   : > { %1120 = vst [vmem:[%s429_s5 + $0x8] sm:$0xff] %v1108_v35   ;;  %v1103_v38 = vpack.c.bf16 %v833_v36, %v830_v34  ;;  %v854_v41 = vadd.f32 %v1161_v37, %v1083_v28 }
 0x23b   : > { %v845_v39 = vpop.f32.mrf.mxu0 }
 0x23c   : > { %1104 = vst [vmem:[%s429_s5] sm:$0xff] %v1103_v38   ;;  %v846_v44 = vadd.f32 %v1083_v28, %v845_v39 }
 0x23d   : > { %v1162_v40 = vpop.f32.mrf.mxu0 }
 0x23e   : > { %v857_v42 = vadd.f32 %v1162_v40, %v1083_v28 }
 0x23f   : > { %v848_v43 = vpop.f32.mrf.mxu0 }
 0x240   : > { %v1118_v45 = vpack.c.bf16 %v857_v42, %v854_v41  ;;  %v849_v46 = vadd.f32 %v1083_v28, %v848_v43 }
 0x242   : > { %1122 = vst [vmem:[%s429_s5 + $0x18] sm:$0xff] %v1118_v45   ;;  %v1113_v47 = vpack.c.bf16 %v849_v46, %v846_v44 }
 0x244   : > { %1121 = vst [vmem:[%s429_s5 + $0x10] sm:$0xff] %v1113_v47  }
 0x245   : > { %1441 = shalt.err (!%p1438_p2)
}
 0x246   : > { %s1442_s8 = scalar_lea.hbm %s1765_s0, 512  ;;  %s1446_s9 = scalar_lea.hbm %s1820_s7, 1024 }
 0x247   : > { %p1443_p4 = scmp.ne.s32.totalorder %s1765_s0, %s1442_s8  ;;  %p1447_p7 = scmp.lt.s32.totalorder %s1765_s0, %s1820_s7 }
 0x248   : > { %p1448_p6 = scmp.lt.s32.totalorder %s1446_s9, %s1442_s8 }
 0x249   : > { %p1444_p1 = pnand %p1443_p4, %p1671_p5 }
 0x24a   : > { %p1449_p12 = por %p1448_p6, %p1447_p7 }
 0x24b   : > { %p1445_p8 = pneg %p1444_p1 }
 0x24d   : > { %p1450_p0 = pnand %p1449_p12, %p1445_p8 }
 0x24f   : > { %1453 = shalt.err (!%p1450_p0)
}
 0x250   : > { %s1533_s3 = smov 64   ;;  %s1534_s5 = smov 4  }
 0x251   : > { %1179 = dma.vmem_to_hbm [thread:$0]  (%p1671_p5), %s1760_s23, 512, %s1765_s0, %s877_s18, %s1533_s3, %s1533_s3, %s1534_s5  }
 0x252 PF: > { %s909_s20 = sand.u32 1, %s1500_s24   ;;  %p1845_p3 = scmp.ne.s32.totalorder %s1829_s10, 0 }
 0x253   : > { %p1846_p10 = scmp.ge.s32.totalorder %s1520_s29, 2  ;;  %s910_s15 = scalar_lea.sflag [#allocation6], %s909_s20 }
 0x255   : > { %p1199_p11 = pnand %p1846_p10, %p1845_p3 }
 0x257   : > { %p1200_p9 = pneg %p1199_p11 }
 0x259   : > { %1495 = dma.done.wait (%p1200_p9), %s910_s15, 512  }
 0x25a   : > { %1497 = vsyncadd (%p1200_p9), %s910_s15, 4294966784  ;;  %s27_s29 = sadd.s32 1, %s1520_s29   ;;  %s1847_s14 = sld [smem:[#allocation19_spill]] }
 0x25b   : > { %p24_p13 = scmp.ge.s32.totalorder %s27_s29, 4   ;;  %s1848_s24 = smov %s1504_s25 }
 0x25c   : > { %s1849_s25 = smov %s1508_s26  ;;  %s1850_s26 = smov %s1683_s21 }
 0x25d   : > { %s1851_s27 = smov %s1516_s28  ;;  %26 = sbr.rel (!%p24_p13) target bundleno = 14 (0xe), region = 130 }
 0x260   : > { %s1852_s28 = smov %s1847_s14 }
 0x262   :  { %915 = vsyncpa [#allocation5], 1 }
 0x263   :  { %917 = vsyncpa [#allocation5 + $0x1], 1 }
 0x264   :  { %918 = vsyncpa [#allocation8], 1 }
 0x265   :  { %920 = vsyncpa [#allocation8 + $0x1], 1 }
 0x266   :  { %921 = vsyncpa [#allocation11], 1 }
 0x267   :  { %922 = vsyncpa [#allocation6], 1 }
 0x268   :  { %924 = vsyncpa [#allocation6 + $0x1], 1 }

</bundles_post_ra>
